<compile_context>
chip_gen: v7x
topology: tpu7x:2x2x1
jax: 0.10.0
libtpu: 0.0.40
codegen_flags: <defaults>
</compile_context>

<pallas_src>
import functools
import math

import jax
import jax.numpy as jnp
from jax.experimental import pallas as pl
from jax.experimental.pallas import tpu as pltpu

_MAX_ROW_TILE = 512                     # rows of B*L per grid step for row-tiled kernels
_VMEM_LIMIT = 48 * 1024 * 1024          # fits under v7x 64 MiB physical; plenty on v5e/v6e
_LN_EPS = 1e-6


# -----------------------------------------------------------------------------
# small in-kernel helpers
# -----------------------------------------------------------------------------
def _ln(x, g, b, eps=_LN_EPS):
    """LayerNorm in f32 (biased variance, matches torch)."""
    mu = jnp.mean(x, axis=-1, keepdims=True)
    xc = x - mu
    var = jnp.mean(xc * xc, axis=-1, keepdims=True)
    return xc * jax.lax.rsqrt(var + eps) * g + b


def _mm(a, w, bias=None):
    """bf16 MXU matmul with f32 accumulation."""
    y = jnp.dot(a.astype(jnp.bfloat16), w, preferred_element_type=jnp.float32)
    if bias is not None:
        y = y + bias
    return y


# -----------------------------------------------------------------------------
# fused kernels
# -----------------------------------------------------------------------------
def _input_stage_kernel(*refs, n_hidden, scale):
    """prenet (Linear+ReLU)*n_hidden + Linear  ->  dec_in_proj (split, no concat)
       -> masked_fill -> * sqrt(d_model)."""
    o_ref = refs[-1]
    inp_ref, mem_ref, pad_ref = refs[0], refs[1], refs[2]
    idx = 3
    h = inp_ref[...]
    for _ in range(n_hidden):
        w_ref, b_ref = refs[idx], refs[idx + 1]
        idx += 2
        h = jnp.maximum(_mm(h, w_ref[...], b_ref[...]), 0.0)
    w_ref, b_ref = refs[idx], refs[idx + 1]
    idx += 2
    h = _mm(h, w_ref[...], b_ref[...])
    wmem_ref, wpre_ref, bdec_ref = refs[idx], refs[idx + 1], refs[idx + 2]
    x = (_mm(mem_ref[...], wmem_ref[...]) + _mm(h, wpre_ref[...]) + bdec_ref[...]) * scale
    o_ref[...] = jnp.where(pad_ref[...] > 0.5, 0.0, x)


def _qkv_kernel(x_ref, mem_ref, g_ref, b_ref, wqkv_ref, bqkv_ref,
                wkvh_ref, bkvh_ref, qkv_ref, kvh_ref):
    """pre-LN + fused [q|k_x|v_x] projection from x and [k_h|v_h] projection from memory."""
    xn = _ln(x_ref[...], g_ref[...], b_ref[...])
    qkv_ref[...] = _mm(xn, wqkv_ref[...], bqkv_ref[...]).astype(jnp.bfloat16)
    kvh_ref[...] = _mm(mem_ref[...], wkvh_ref[...], bkvh_ref[...]).astype(jnp.bfloat16)


def _pnca_attn_kernel(bw_ref, qkv_ref, kvh_ref, x_ref, pad_row_ref, pad_col_ref,
                      wfcx_ref, bfcx_ref, wfch_ref, bfch_ref,
                      o_ref, *attn_refs, n_head, d_head, inv_temp, return_attns):
    """Banded self-attn (causal band) + banded memory-attn (forward band) for ALL heads
       of one batch element, then fc_x + fc_h + residual + padding zero-fill."""
    L = qkv_ref.shape[1]
    d_hh = n_head * d_head

    qkv = qkv_ref[0]            # (L, 3*H*dh) bf16
    kvh = kvh_ref[0]            # (L, 2*H*dh) bf16
    x = x_ref[0]                # (L, d_model) f32 residual
    pad_k = pad_row_ref[0] > 0.5        # (1, L)
    pad_q = pad_col_ref[0] > 0.5        # (L, 1)
    xbw = bw_ref[0]
    hbw = bw_ref[1]

    qi = jax.lax.broadcasted_iota(jnp.int32, (L, L), 0)
    kj = jax.lax.broadcasted_iota(jnp.int32, (L, L), 1)
    not_pad_q = jnp.logical_not(pad_q)
    # x (self) attention: allowed keys k in [q - xbw, q]   (causal band)
    x_dis = (((kj > qi) | (kj < qi - xbw)) | pad_k) & not_pad_q
    # h (memory) attention: allowed keys k in [q, q + hbw] (forward band)
    h_dis = (((kj < qi) | (kj > qi + hbw)) | pad_k) & not_pad_q

    q_all = qkv[:, 0:d_hh]
    kx_all = qkv[:, d_hh:2 * d_hh]
    vx_all = qkv[:, 2 * d_hh:3 * d_hh]
    kh_all = kvh[:, 0:d_hh]
    vh_all = kvh[:, d_hh:2 * d_hh]

    neg = jnp.float32(-1e30)    # large finite negative: no NaN for fully-masked rows

    def banded_attn(qh, kh, vh, dis):
        s = jax.lax.dot_general(
            qh, kh, dimension_numbers=(((1,), (1,)), ((), ())),
            preferred_element_type=jnp.float32) * inv_temp
        s = jnp.where(dis, neg, s)
        m = jnp.max(s, axis=-1, keepdims=True)
        e = jnp.exp(s - m)
        p = e * pl.reciprocal(jnp.sum(e, axis=-1, keepdims=True), approx=True)
        o = jnp.dot(p.astype(jnp.bfloat16), vh, preferred_element_type=jnp.float32)
        return p, o

    ox_list, oh_list = [], []
    for h in range(n_head):
        sl = slice(h * d_head, (h + 1) * d_head)
        p_x, o_x = banded_attn(q_all[:, sl], kx_all[:, sl], vx_all[:, sl], x_dis)
        p_h, o_h = banded_attn(q_all[:, sl], kh_all[:, sl], vh_all[:, sl], h_dis)
        ox_list.append(o_x)
        oh_list.append(o_h)
        if return_attns:
            attn_refs[0][0, h] = p_x
            attn_refs[1][0, h] = p_h

    ox = jnp.concatenate(ox_list, axis=-1)      # (L, H*dh)
    oh = jnp.concatenate(oh_list, axis=-1)
    out = _mm(ox, wfcx_ref[...], bfcx_ref[...]) + _mm(oh, wfch_ref[...], bfch_ref[...])
    out = out + x
    o_ref[0] = jnp.where(pad_q, 0.0, out)


def _ffn_kernel(x_ref, pad_ref, g_ref, b_ref, w1_ref, b1_ref, w2_ref, b2_ref, o_ref):
    """pre-LN position-wise FFN (1x1 convs == linears) + residual, fully in VMEM."""
    x = x_ref[...]
    y = _ln(x, g_ref[...], b_ref[...])
    a = jnp.maximum(_mm(y, w1_ref[...], b1_ref[...]), 0.0)
    z = _mm(a, w2_ref[...], b2_ref[...]) + x
    o_ref[...] = jnp.where(pad_ref[...] > 0.5, 0.0, z)


def _out_kernel(x_ref, g_ref, b_ref, w_ref, bo_ref, o_ref):
    """final LayerNorm + dec_out_proj."""
    y = _ln(x_ref[...], g_ref[...], b_ref[...])
    o_ref[...] = _mm(y, w_ref[...], bo_ref[...])


# -----------------------------------------------------------------------------
# pallas_call wrappers
# -----------------------------------------------------------------------------
def _call_row_tiled(kernel_fn, row_args, const_args, out_dims):
    """Row-tiled (over B*L) fused kernel. row_args: (M, K_i) arrays tiled on rows;
       const_args: small weights broadcast to every grid step."""
    M = row_args[0].shape[0]
    TM = M if M <= _MAX_ROW_TILE else _MAX_ROW_TILE
    grid = (pl.cdiv(M, TM),)

    in_specs = []
    for a in row_args:
        in_specs.append(pl.BlockSpec((TM, a.shape[1]), lambda i: (i, 0)))
    for a in const_args:
        in_specs.append(pl.BlockSpec(a.shape, lambda i, _nd=a.ndim: (0,) * _nd))

    out_shape = tuple(jax.ShapeDtypeStruct((M, n), dt) for (n, dt) in out_dims)
    out_specs = tuple(pl.BlockSpec((TM, n), lambda i: (i, 0)) for (n, _) in out_dims)
    single = len(out_dims) == 1

    return pl.pallas_call(
        kernel_fn,
        grid=grid,
        in_specs=in_specs,
        out_specs=out_specs[0] if single else out_specs,
        out_shape=out_shape[0] if single else out_shape,
        compiler_params=pltpu.CompilerParams(
            dimension_semantics=("parallel",),
            vmem_limit_bytes=_VMEM_LIMIT),
    )(*row_args, *const_args)


def _pnca_attention(bw, qkv, kvh, x, pad_row, pad_col,
                    wfcx, bfcx, wfch, bfch, n_head, d_head, return_attns):
    """Dual banded attention per batch element; band widths via scalar prefetch."""
    B, L, _ = qkv.shape
    d_model = x.shape[-1]
    d_hh = n_head * d_head

    kernel = functools.partial(
        _pnca_attn_kernel, n_head=n_head, d_head=d_head,
        inv_temp=1.0 / (float(d_head) ** 0.5), return_attns=return_attns)

    in_specs = [
        pl.BlockSpec((1, L, 3 * d_hh), lambda b, bw_: (b, 0, 0)),
        pl.BlockSpec((1, L, 2 * d_hh), lambda b, bw_: (b, 0, 0)),
        pl.BlockSpec((1, L, d_model), lambda b, bw_: (b, 0, 0)),
        pl.BlockSpec((1, 1, L), lambda b, bw_: (b, 0, 0)),
        pl.BlockSpec((1, L, 1), lambda b, bw_: (b, 0, 0)),
        pl.BlockSpec((d_hh, d_model), lambda b, bw_: (0, 0)),
        pl.BlockSpec((1, d_model), lambda b, bw_: (0, 0)),
        pl.BlockSpec((d_hh, d_model), lambda b, bw_: (0, 0)),
        pl.BlockSpec((1, d_model), lambda b, bw_: (0, 0)),
    ]
    out_shapes = [jax.ShapeDtypeStruct((B, L, d_model), jnp.float32)]
    out_specs = [pl.BlockSpec((1, L, d_model), lambda b, bw_: (b, 0, 0))]
    if return_attns:
        out_shapes += [jax.ShapeDtypeStruct((B, n_head, L, L), jnp.float32)] * 2
        out_specs += [pl.BlockSpec((1, n_head, L, L), lambda b, bw_: (b, 0, 0, 0))] * 2

    grid_spec = pltpu.PrefetchScalarGridSpec(
        num_scalar_prefetch=1,
        grid=(B,),
        in_specs=in_specs,
        out_specs=tuple(out_specs) if return_attns else out_specs[0],
    )
    res = pl.pallas_call(
        kernel,
        grid_spec=grid_spec,
        out_shape=tuple(out_shapes) if return_attns else out_shapes[0],
        compiler_params=pltpu.CompilerParams(
            dimension_semantics=("parallel",),
            vmem_limit_bytes=_VMEM_LIMIT),
    )(bw, qkv, kvh, x, pad_row, pad_col, wfcx, bfcx, wfch, bfch)

    if return_attns:
        out, a_x, a_h = res
    else:
        out, a_x, a_h = res, None, None
    return out, a_x, a_h


# -----------------------------------------------------------------------------
# parameters (deterministic init mimicking nn.Linear defaults; matmul weights in bf16)
# -----------------------------------------------------------------------------
def _dense_init(key, d_in, d_out):
    kw, kb = jax.random.split(key)
    bound = 1.0 / math.sqrt(d_in)
    w = jax.random.uniform(kw, (d_in, d_out), jnp.float32, -bound, bound)
    b = jax.random.uniform(kb, (d_out,), jnp.float32, -bound, bound)
    return w, b


def init_params(key, d_in, prenet_units, n_layer, d_model, d_mem, n_head, d_head,
                d_inner, d_out):
    keys = iter(jax.random.split(key, 16 + 2 * len(prenet_units) + 16 * n_layer))
    d_hh = n_head * d_head
    p = {}

    # Prenet
    hidden = []
    dims = [d_in] + list(prenet_units)
    for a, b in zip(dims[:-1], dims[1:]):
        w, bb = _dense_init(next(keys), a, b)
        hidden.append((w.astype(jnp.bfloat16), bb.reshape(1, -1)))
    w, bb = _dense_init(next(keys), prenet_units[-1], d_model)
    p["prenet"] = {"hidden": hidden, "out": (w.astype(jnp.bfloat16), bb.reshape(1, -1))}

    # dec_in_proj on concat([memory, prenet_out]) -> split weight rows (no concat at runtime)
    w, bb = _dense_init(next(keys), d_model + d_mem, d_model)
    p["dec_in_w_mem"] = w[:d_mem].astype(jnp.bfloat16)
    p["dec_in_w_pre"] = w[d_mem:].astype(jnp.bfloat16)
    p["dec_in_b"] = bb.reshape(1, -1)

    # PNCA layers (fused QKV / KV weights)
    layers = []
    for _ in range(n_layer):
        wq, bq = _dense_init(next(keys), d_model, d_hh)
        wkx, bkx = _dense_init(next(keys), d_model, d_hh)
        wvx, bvx = _dense_init(next(keys), d_model, d_hh)
        wkh, bkh = _dense_init(next(keys), d_mem, d_hh)
        wvh, bvh = _dense_init(next(keys), d_mem, d_hh)
        wfx, bfx = _dense_init(next(keys), d_hh, d_model)
        wfh, bfh = _dense_init(next(keys), d_hh, d_model)
        w1, b1 = _dense_init(next(keys), d_model, d_inner)   # Conv1d k=1
        w2, b2 = _dense_init(next(keys), d_inner, d_model)   # Conv1d k=1
        layers.append({
            "attn_ln_g": jnp.ones((1, d_model), jnp.float32),
            "attn_ln_b": jnp.zeros((1, d_model), jnp.float32),
            "w_qkv_x": jnp.concatenate([wq, wkx, wvx], axis=1).astype(jnp.bfloat16),
            "b_qkv_x": jnp.concatenate([bq, bkx, bvx]).reshape(1, -1),
            "w_kv_h": jnp.concatenate([wkh, wvh], axis=1).astype(jnp.bfloat16),
            "b_kv_h": jnp.concatenate([bkh, bvh]).reshape(1, -1),
            "fc_x_w": wfx.astype(jnp.bfloat16), "fc_x_b": bfx.reshape(1, -1),
            "fc_h_w": wfh.astype(jnp.bfloat16), "fc_h_b": bfh.reshape(1, -1),
            "ffn_ln_g": jnp.ones((1, d_model), jnp.float32),
            "ffn_ln_b": jnp.zeros((1, d_model), jnp.float32),
            "ffn_w1": w1.astype(jnp.bfloat16), "ffn_b1": b1.reshape(1, -1),
            "ffn_w2": w2.astype(jnp.bfloat16), "ffn_b2": b2.reshape(1, -1),
        })
    p["pnca"] = layers

    p["ln_g"] = jnp.ones((1, d_model), jnp.float32)
    p["ln_b"] = jnp.zeros((1, d_model), jnp.float32)
    w, bb = _dense_init(next(keys), d_model, d_out)
    p["dec_out_w"] = w.astype(jnp.bfloat16)   # TODO(synk): could pad d_out to 128 lanes for unmasked stores
    p["dec_out_b"] = bb.reshape(1, -1)
    return p


# -----------------------------------------------------------------------------
# forward pass
# -----------------------------------------------------------------------------
def hybrid_attention_decoder_forward(params, inp, memory, x_band_width, h_band_width,
                                     mask=None, cfg=None, return_attns=False):
    d_model, n_head, d_head = cfg["d_model"], cfg["n_head"], cfg["d_head"]
    B, L, d_in = inp.shape
    M = B * L

    # padding mask as float (1.0 = padded); zeros when mask is None
    padf = mask.astype(jnp.float32) if mask is not None else jnp.zeros((B, L), jnp.float32)
    pad_flat = padf.reshape(M, 1)
    pad_row = padf.reshape(B, 1, L)
    pad_col = padf.reshape(B, L, 1)

    # dynamic band widths -> SMEM via scalar prefetch (kept traced, not baked in)
    bw = jnp.stack([jnp.asarray(x_band_width, jnp.int32),
                    jnp.asarray(h_band_width, jnp.int32)])

    inp2 = inp.reshape(M, d_in)
    mem2 = memory.reshape(M, memory.shape[-1])

    # --- fused input stage: prenet + dec_in_proj + masked_fill + *sqrt(d_model) ---
    pre = params["prenet"]
    const_args = []
    for (w, b) in pre["hidden"]:
        const_args += [w, b]
    const_args += [pre["out"][0], pre["out"][1],
                   params["dec_in_w_mem"], params["dec_in_w_pre"], params["dec_in_b"]]
    dec2 = _call_row_tiled(
        functools.partial(_input_stage_kernel, n_hidden=len(pre["hidden"]),
                          scale=float(d_model) ** 0.5),
        row_args=[inp2, mem2, pad_flat],
        const_args=const_args,
        out_dims=[(d_model, jnp.float32)],
    )

    d_hh = n_head * d_head
    attn_x_list, attn_h_list = [], []
    for layer in params["pnca"]:
        # fused pre-LN + [q|k_x|v_x] and [k_h|v_h] projections (bf16 intermediates)
        qkv2, kvh2 = _call_row_tiled(
            _qkv_kernel,
            row_args=[dec2, mem2],
            const_args=[layer["attn_ln_g"], layer["attn_ln_b"],
                        layer["w_qkv_x"], layer["b_qkv_x"],
                        layer["w_kv_h"], layer["b_kv_h"]],
            out_dims=[(3 * d_hh, jnp.bfloat16), (2 * d_hh, jnp.bfloat16)],
        )
        # banded dual attention + fc_x/fc_h + residual (one grid step per batch elem)
        attn_out, a_x, a_h = _pnca_attention(
            bw,
            qkv2.reshape(B, L, 3 * d_hh),
            kvh2.reshape(B, L, 2 * d_hh),
            dec2.reshape(B, L, d_model),
            pad_row, pad_col,
            layer["fc_x_w"], layer["fc_x_b"], layer["fc_h_w"], layer["fc_h_b"],
            n_head, d_head, return_attns)
        # fused FFN (LN -> conv1 -> ReLU -> conv2 + residual), intermediates stay in VMEM
        dec2 = _call_row_tiled(
            _ffn_kernel,
            row_args=[attn_out.reshape(M, d_model), pad_flat],
            const_args=[layer["ffn_ln_g"], layer["ffn_ln_b"],
                        layer["ffn_w1"], layer["ffn_b1"],
                        layer["ffn_w2"], layer["ffn_b2"]],
            out_dims=[(d_model, jnp.float32)],
        )
        if return_attns:
            attn_x_list.append(a_x.reshape(B * n_head, L, L))
            attn_h_list.append(a_h.reshape(B * n_head, L, L))

    # --- fused output stage: LayerNorm + dec_out_proj ---
    d_out = params["dec_out_w"].shape[1]
    out2 = _call_row_tiled(
        _out_kernel,
        row_args=[dec2],
        const_args=[params["ln_g"], params["ln_b"],
                    params["dec_out_w"], params["dec_out_b"]],
        out_dims=[(d_out, jnp.float32)],
    )
    return out2.reshape(B, L, d_out), attn_x_list, attn_h_list


# -----------------------------------------------------------------------------
if __name__ == "__main__":
    # Small config consistent with the module signature.
    B, L = 2, 16
    d_in, prenet_units, n_layer = 8, [32, 32], 2
    d_model, d_mem, n_head, d_head, d_inner, d_out = 32, 32, 2, 16, 64, 8
    cfg = {"d_model": d_model, "n_head": n_head, "d_head": d_head}

    key = jax.random.PRNGKey(0)
    kp, kx, km = jax.random.split(key, 3)
    params = init_params(kp, d_in, prenet_units, n_layer, d_model, d_mem, n_head,
                         d_head, d_inner, d_out)
    inp = jax.random.normal(kx, (B, L, d_in), jnp.float32)       # decoder input frames
    memory = jax.random.normal(km, (B, L, d_mem), jnp.float32)   # encoder memory

    fwd = jax.jit(functools.partial(hybrid_attention_decoder_forward,
                                    mask=None, cfg=cfg, return_attns=True))
    dec_out, attn_x_list, attn_h_list = fwd(params, inp, memory,
                                            jnp.int32(3), jnp.int32(5))
    jax.block_until_ready(dec_out)

    assert dec_out.shape == (B, L, d_out)
    assert len(attn_x_list) == n_layer and attn_x_list[0].shape == (B * n_head, L, L)
    assert bool(jnp.all(jnp.isfinite(dec_out)))
    print("KERNEL_OK")
</pallas_src>

<mosaic_0001>
module attributes {stable_mosaic.version = 11 : i64} {
  func.func @_qkv_kernel(%arg0: i32, %arg1: memref<32x32xf32, #tpu.memory_space<vmem>>, %arg2: memref<32x32xf32, #tpu.memory_space<vmem>>, %arg3: memref<1x32xf32, #tpu.memory_space<vmem>>, %arg4: memref<1x32xf32, #tpu.memory_space<vmem>>, %arg5: memref<32x96xbf16, #tpu.memory_space<vmem>>, %arg6: memref<1x96xf32, #tpu.memory_space<vmem>>, %arg7: memref<32x64xbf16, #tpu.memory_space<vmem>>, %arg8: memref<1x64xf32, #tpu.memory_space<vmem>>, %arg9: memref<32x96xbf16, #tpu.memory_space<vmem>>, %arg10: memref<32x64xbf16, #tpu.memory_space<vmem>>) attributes {dimension_semantics = [#tpu.dimension_semantics<parallel>], iteration_bounds = array<i64: 1>, scalar_prefetch = 0 : i64, scratch_operands = 0 : i64, tpu.core_type = #tpu.core_type<tc>, window_params = [{transform_indices = @transform_0, window_bounds = array<i64: 32, 32>}, {transform_indices = @transform_1, window_bounds = array<i64: 32, 32>}, {pipeline_mode = #tpu.pipeline_mode<synchronous>, transform_indices = @transform_2, window_bounds = array<i64: 1, 32>}, {pipeline_mode = #tpu.pipeline_mode<synchronous>, transform_indices = @transform_3, window_bounds = array<i64: 1, 32>}, {pipeline_mode = #tpu.pipeline_mode<synchronous>, transform_indices = @transform_4, window_bounds = array<i64: 32, 96>}, {pipeline_mode = #tpu.pipeline_mode<synchronous>, transform_indices = @transform_5, window_bounds = array<i64: 1, 96>}, {pipeline_mode = #tpu.pipeline_mode<synchronous>, transform_indices = @transform_6, window_bounds = array<i64: 32, 64>}, {pipeline_mode = #tpu.pipeline_mode<synchronous>, transform_indices = @transform_7, window_bounds = array<i64: 1, 64>}, {transform_indices = @transform_8, window_bounds = array<i64: 32, 96>}, {transform_indices = @transform_9, window_bounds = array<i64: 32, 64>}]} {
    %c0 = arith.constant 0 : index
    %c0_0 = arith.constant 0 : index
    %0 = vector.load %arg1[%c0, %c0_0] : memref<32x32xf32, #tpu.memory_space<vmem>>, vector<32x32xf32>
    %c0_1 = arith.constant 0 : index
    %c0_2 = arith.constant 0 : index
    %1 = vector.load %arg3[%c0_1, %c0_2] : memref<1x32xf32, #tpu.memory_space<vmem>>, vector<1x32xf32>
    %c0_3 = arith.constant 0 : index
    %c0_4 = arith.constant 0 : index
    %2 = vector.load %arg4[%c0_3, %c0_4] : memref<1x32xf32, #tpu.memory_space<vmem>>, vector<1x32xf32>
    %cst = arith.constant dense<0.000000e+00> : vector<32xf32>
    %3 = vector.multi_reduction <add>, %0, %cst [1] : vector<32x32xf32> to vector<32xf32>
    %4 = vector.shape_cast %3 : vector<32xf32> to vector<32x1xf32>
    %cst_5 = arith.constant 3.200000e+01 : f32
    %5 = vector.broadcast %cst_5 : f32 to vector<32x1xf32>
    %6 = arith.divf %4, %5 : vector<32x1xf32>
    %7 = vector.broadcast %6 : vector<32x1xf32> to vector<32x32xf32>
    %8 = arith.subf %0, %7 : vector<32x32xf32>
    %9 = arith.mulf %8, %8 : vector<32x32xf32>
    %cst_6 = arith.constant dense<0.000000e+00> : vector<32xf32>
    %10 = vector.multi_reduction <add>, %9, %cst_6 [1] : vector<32x32xf32> to vector<32xf32>
    %11 = vector.shape_cast %10 : vector<32xf32> to vector<32x1xf32>
    %cst_7 = arith.constant 3.200000e+01 : f32
    %12 = vector.broadcast %cst_7 : f32 to vector<32x1xf32>
    %13 = arith.divf %11, %12 : vector<32x1xf32>
    %cst_8 = arith.constant 9.99999997E-7 : f32
    %14 = vector.broadcast %cst_8 : f32 to vector<32x1xf32>
    %15 = arith.addf %13, %14 : vector<32x1xf32>
    %16 = math.rsqrt %15 : vector<32x1xf32>
    %17 = vector.broadcast %16 : vector<32x1xf32> to vector<32x32xf32>
    %18 = arith.mulf %8, %17 : vector<32x32xf32>
    %19 = vector.broadcast %1 : vector<1x32xf32> to vector<32x32xf32>
    %20 = arith.mulf %18, %19 : vector<32x32xf32>
    %21 = vector.broadcast %2 : vector<1x32xf32> to vector<32x32xf32>
    %22 = arith.addf %20, %21 : vector<32x32xf32>
    %c0_9 = arith.constant 0 : index
    %c0_10 = arith.constant 0 : index
    %23 = vector.load %arg5[%c0_9, %c0_10] : memref<32x96xbf16, #tpu.memory_space<vmem>>, vector<32x96xbf16>
    %c0_11 = arith.constant 0 : index
    %c0_12 = arith.constant 0 : index
    %24 = vector.load %arg6[%c0_11, %c0_12] : memref<1x96xf32, #tpu.memory_space<vmem>>, vector<1x96xf32>
    %25 = arith.truncf %22 : vector<32x32xf32> to vector<32x32xbf16>
    %cst_13 = arith.constant dense<0.000000e+00> : vector<32x96xf32>
    %26 = tpu.matmul %25, %23, %cst_13 {dimension_numbers = #tpu.dot_dimension_numbers<[1], [0], [0], [1], [0, 0, 1, 1], [], []>} : vector<32x32xbf16>, vector<32x96xbf16>, vector<32x96xf32> -> vector<32x96xf32>
    %27 = vector.broadcast %24 : vector<1x96xf32> to vector<32x96xf32>
    %28 = arith.addf %26, %27 : vector<32x96xf32>
    %29 = arith.truncf %28 : vector<32x96xf32> to vector<32x96xbf16>
    %c0_14 = arith.constant 0 : index
    %c0_15 = arith.constant 0 : index
    %30 = vector.load %arg9[%c0_14, %c0_15] : memref<32x96xbf16, #tpu.memory_space<vmem>>, vector<32x96xbf16>
    tpu.vector_store %arg9[%c0_14, %c0_15], %29 {strides = array<i32>} : memref<32x96xbf16, #tpu.memory_space<vmem>>, vector<32x96xbf16>,
    %c0_16 = arith.constant 0 : index
    %c0_17 = arith.constant 0 : index
    %31 = vector.load %arg2[%c0_16, %c0_17] : memref<32x32xf32, #tpu.memory_space<vmem>>, vector<32x32xf32>
    %c0_18 = arith.constant 0 : index
    %c0_19 = arith.constant 0 : index
    %32 = vector.load %arg7[%c0_18, %c0_19] : memref<32x64xbf16, #tpu.memory_space<vmem>>, vector<32x64xbf16>
    %c0_20 = arith.constant 0 : index
    %c0_21 = arith.constant 0 : index
    %33 = vector.load %arg8[%c0_20, %c0_21] : memref<1x64xf32, #tpu.memory_space<vmem>>, vector<1x64xf32>
    %34 = arith.truncf %31 : vector<32x32xf32> to vector<32x32xbf16>
    %cst_22 = arith.constant dense<0.000000e+00> : vector<32x64xf32>
    %35 = tpu.matmul %34, %32, %cst_22 {dimension_numbers = #tpu.dot_dimension_numbers<[1], [0], [0], [1], [0, 0, 1, 1], [], []>} : vector<32x32xbf16>, vector<32x64xbf16>, vector<32x64xf32> -> vector<32x64xf32>
    %36 = vector.broadcast %33 : vector<1x64xf32> to vector<32x64xf32>
    %37 = arith.addf %35, %36 : vector<32x64xf32>
    %38 = arith.truncf %37 : vector<32x64xf32> to vector<32x64xbf16>
    %c0_23 = arith.constant 0 : index
    %c0_24 = arith.constant 0 : index
    %39 = vector.load %arg10[%c0_23, %c0_24] : memref<32x64xbf16, #tpu.memory_space<vmem>>, vector<32x64xbf16>
    tpu.vector_store %arg10[%c0_23, %c0_24], %38 {strides = array<i32>} : memref<32x64xbf16, #tpu.memory_space<vmem>>, vector<32x64xbf16>,
    return
  }
  func.func @transform_0(%arg0: i32) -> (i32, i32) {
    %c0_i32 = arith.constant 0 : i32
    %c0_i32_0 = arith.constant 0 : i32
    return %arg0, %c0_i32 : i32, i32
  }
  func.func @transform_1(%arg0: i32) -> (i32, i32) {
    %c0_i32 = arith.constant 0 : i32
    %c0_i32_0 = arith.constant 0 : i32
    return %arg0, %c0_i32 : i32, i32
  }
  func.func @transform_2(%arg0: i32) -> (i32, i32) {
    %c0_i32 = arith.constant 0 : i32
    %c0_i32_0 = arith.constant 0 : i32
    %c0_i32_1 = arith.constant 0 : i32
    return %c0_i32, %c0_i32_0 : i32, i32
  }
  func.func @transform_3(%arg0: i32) -> (i32, i32) {
    %c0_i32 = arith.constant 0 : i32
    %c0_i32_0 = arith.constant 0 : i32
    %c0_i32_1 = arith.constant 0 : i32
    return %c0_i32, %c0_i32_0 : i32, i32
  }
  func.func @transform_4(%arg0: i32) -> (i32, i32) {
    %c0_i32 = arith.constant 0 : i32
    %c0_i32_0 = arith.constant 0 : i32
    %c0_i32_1 = arith.constant 0 : i32
    return %c0_i32, %c0_i32_0 : i32, i32
  }
  func.func @transform_5(%arg0: i32) -> (i32, i32) {
    %c0_i32 = arith.constant 0 : i32
    %c0_i32_0 = arith.constant 0 : i32
    %c0_i32_1 = arith.constant 0 : i32
    return %c0_i32, %c0_i32_0 : i32, i32
  }
  func.func @transform_6(%arg0: i32) -> (i32, i32) {
    %c0_i32 = arith.constant 0 : i32
    %c0_i32_0 = arith.constant 0 : i32
    %c0_i32_1 = arith.constant 0 : i32
    return %c0_i32, %c0_i32_0 : i32, i32
  }
  func.func @transform_7(%arg0: i32) -> (i32, i32) {
    %c0_i32 = arith.constant 0 : i32
    %c0_i32_0 = arith.constant 0 : i32
    %c0_i32_1 = arith.constant 0 : i32
    return %c0_i32, %c0_i32_0 : i32, i32
  }
  func.func @transform_8(%arg0: i32) -> (i32, i32) {
    %c0_i32 = arith.constant 0 : i32
    %c0_i32_0 = arith.constant 0 : i32
    return %arg0, %c0_i32 : i32, i32
  }
  func.func @transform_9(%arg0: i32) -> (i32, i32) {
    %c0_i32 = arith.constant 0 : i32
    %c0_i32_0 = arith.constant 0 : i32
    return %arg0, %c0_i32 : i32, i32
  }
}

module attributes {stable_mosaic.version = 11 : i64} {
  func.func @_input_stage_kernel(%arg0: i32, %arg1: memref<32x8xf32, #tpu.memory_space<vmem>>, %arg2: memref<32x32xf32, #tpu.memory_space<vmem>>, %arg3: memref<32x1xf32, #tpu.memory_space<vmem>>, %arg4: memref<8x32xbf16, #tpu.memory_space<vmem>>, %arg5: memref<1x32xf32, #tpu.memory_space<vmem>>, %arg6: memref<32x32xbf16, #tpu.memory_space<vmem>>, %arg7: memref<1x32xf32, #tpu.memory_space<vmem>>, %arg8: memref<32x32xbf16, #tpu.memory_space<vmem>>, %arg9: memref<1x32xf32, #tpu.memory_space<vmem>>, %arg10: memref<32x32xbf16, #tpu.memory_space<vmem>>, %arg11: memref<32x32xbf16, #tpu.memory_space<vmem>>, %arg12: memref<1x32xf32, #tpu.memory_space<vmem>>, %arg13: memref<32x32xf32, #tpu.memory_space<vmem>>) attributes {dimension_semantics = [#tpu.dimension_semantics<parallel>], iteration_bounds = array<i64: 1>, scalar_prefetch = 0 : i64, scratch_operands = 0 : i64, tpu.core_type = #tpu.core_type<tc>, window_params = [{transform_indices = @transform_0, window_bounds = array<i64: 32, 8>}, {transform_indices = @transform_1, window_bounds = array<i64: 32, 32>}, {transform_indices = @transform_2, window_bounds = array<i64: 32, 1>}, {pipeline_mode = #tpu.pipeline_mode<synchronous>, transform_indices = @transform_3, window_bounds = array<i64: 8, 32>}, {pipeline_mode = #tpu.pipeline_mode<synchronous>, transform_indices = @transform_4, window_bounds = array<i64: 1, 32>}, {pipeline_mode = #tpu.pipeline_mode<synchronous>, transform_indices = @transform_5, window_bounds = array<i64: 32, 32>}, {pipeline_mode = #tpu.pipeline_mode<synchronous>, transform_indices = @transform_6, window_bounds = array<i64: 1, 32>}, {pipeline_mode = #tpu.pipeline_mode<synchronous>, transform_indices = @transform_7, window_bounds = array<i64: 32, 32>}, {pipeline_mode = #tpu.pipeline_mode<synchronous>, transform_indices = @transform_8, window_bounds = array<i64: 1, 32>}, {pipeline_mode = #tpu.pipeline_mode<synchronous>, transform_indices = @transform_9, window_bounds = array<i64: 32, 32>}, {pipeline_mode = #tpu.pipeline_mode<synchronous>, transform_indices = @transform_10, window_bounds = array<i64: 32, 32>}, {pipeline_mode = #tpu.pipeline_mode<synchronous>, transform_indices = @transform_11, window_bounds = array<i64: 1, 32>}, {transform_indices = @transform_12, window_bounds = array<i64: 32, 32>}]} {
    %c0 = arith.constant 0 : index
    %c0_0 = arith.constant 0 : index
    %0 = vector.load %arg1[%c0, %c0_0] : memref<32x8xf32, #tpu.memory_space<vmem>>, vector<32x8xf32>
    %c0_1 = arith.constant 0 : index
    %c0_2 = arith.constant 0 : index
    %1 = vector.load %arg4[%c0_1, %c0_2] : memref<8x32xbf16, #tpu.memory_space<vmem>>, vector<8x32xbf16>
    %c0_3 = arith.constant 0 : index
    %c0_4 = arith.constant 0 : index
    %2 = vector.load %arg5[%c0_3, %c0_4] : memref<1x32xf32, #tpu.memory_space<vmem>>, vector<1x32xf32>
    %3 = arith.truncf %0 : vector<32x8xf32> to vector<32x8xbf16>
    %cst = arith.constant dense<0.000000e+00> : vector<32x32xf32>
    %4 = tpu.matmul %3, %1, %cst {dimension_numbers = #tpu.dot_dimension_numbers<[1], [0], [0], [1], [0, 0, 1, 1], [], []>} : vector<32x8xbf16>, vector<8x32xbf16>, vector<32x32xf32> -> vector<32x32xf32>
    %5 = vector.broadcast %2 : vector<1x32xf32> to vector<32x32xf32>
    %6 = arith.addf %4, %5 : vector<32x32xf32>
    %cst_5 = arith.constant 0.000000e+00 : f32
    %7 = vector.broadcast %cst_5 : f32 to vector<32x32xf32>
    %8 = arith.maximumf %6, %7 : vector<32x32xf32>
    %c0_6 = arith.constant 0 : index
    %c0_7 = arith.constant 0 : index
    %9 = vector.load %arg6[%c0_6, %c0_7] : memref<32x32xbf16, #tpu.memory_space<vmem>>, vector<32x32xbf16>
    %c0_8 = arith.constant 0 : index
    %c0_9 = arith.constant 0 : index
    %10 = vector.load %arg7[%c0_8, %c0_9] : memref<1x32xf32, #tpu.memory_space<vmem>>, vector<1x32xf32>
    %11 = arith.truncf %8 : vector<32x32xf32> to vector<32x32xbf16>
    %cst_10 = arith.constant dense<0.000000e+00> : vector<32x32xf32>
    %12 = tpu.matmul %11, %9, %cst_10 {dimension_numbers = #tpu.dot_dimension_numbers<[1], [0], [0], [1], [0, 0, 1, 1], [], []>} : vector<32x32xbf16>, vector<32x32xbf16>, vector<32x32xf32> -> vector<32x32xf32>
    %13 = vector.broadcast %10 : vector<1x32xf32> to vector<32x32xf32>
    %14 = arith.addf %12, %13 : vector<32x32xf32>
    %cst_11 = arith.constant 0.000000e+00 : f32
    %15 = vector.broadcast %cst_11 : f32 to vector<32x32xf32>
    %16 = arith.maximumf %14, %15 : vector<32x32xf32>
    %c0_12 = arith.constant 0 : index
    %c0_13 = arith.constant 0 : index
    %17 = vector.load %arg8[%c0_12, %c0_13] : memref<32x32xbf16, #tpu.memory_space<vmem>>, vector<32x32xbf16>
    %c0_14 = arith.constant 0 : index
    %c0_15 = arith.constant 0 : index
    %18 = vector.load %arg9[%c0_14, %c0_15] : memref<1x32xf32, #tpu.memory_space<vmem>>, vector<1x32xf32>
    %19 = arith.truncf %16 : vector<32x32xf32> to vector<32x32xbf16>
    %cst_16 = arith.constant dense<0.000000e+00> : vector<32x32xf32>
    %20 = tpu.matmul %19, %17, %cst_16 {dimension_numbers = #tpu.dot_dimension_numbers<[1], [0], [0], [1], [0, 0, 1, 1], [], []>} : vector<32x32xbf16>, vector<32x32xbf16>, vector<32x32xf32> -> vector<32x32xf32>
    %21 = vector.broadcast %18 : vector<1x32xf32> to vector<32x32xf32>
    %22 = arith.addf %20, %21 : vector<32x32xf32>
    %c0_17 = arith.constant 0 : index
    %c0_18 = arith.constant 0 : index
    %23 = vector.load %arg2[%c0_17, %c0_18] : memref<32x32xf32, #tpu.memory_space<vmem>>, vector<32x32xf32>
    %c0_19 = arith.constant 0 : index
    %c0_20 = arith.constant 0 : index
    %24 = vector.load %arg10[%c0_19, %c0_20] : memref<32x32xbf16, #tpu.memory_space<vmem>>, vector<32x32xbf16>
    %25 = arith.truncf %23 : vector<32x32xf32> to vector<32x32xbf16>
    %cst_21 = arith.constant dense<0.000000e+00> : vector<32x32xf32>
    %26 = tpu.matmul %25, %24, %cst_21 {dimension_numbers = #tpu.dot_dimension_numbers<[1], [0], [0], [1], [0, 0, 1, 1], [], []>} : vector<32x32xbf16>, vector<32x32xbf16>, vector<32x32xf32> -> vector<32x32xf32>
    %c0_22 = arith.constant 0 : index
    %c0_23 = arith.constant 0 : index
    %27 = vector.load %arg11[%c0_22, %c0_23] : memref<32x32xbf16, #tpu.memory_space<vmem>>, vector<32x32xbf16>
    %28 = arith.truncf %22 : vector<32x32xf32> to vector<32x32xbf16>
    %cst_24 = arith.constant dense<0.000000e+00> : vector<32x32xf32>
    %29 = tpu.matmul %28, %27, %cst_24 {dimension_numbers = #tpu.dot_dimension_numbers<[1], [0], [0], [1], [0, 0, 1, 1], [], []>} : vector<32x32xbf16>, vector<32x32xbf16>, vector<32x32xf32> -> vector<32x32xf32>
    %30 = arith.addf %26, %29 : vector<32x32xf32>
    %c0_25 = arith.constant 0 : index
    %c0_26 = arith.constant 0 : index
    %31 = vector.load %arg12[%c0_25, %c0_26] : memref<1x32xf32, #tpu.memory_space<vmem>>, vector<1x32xf32>
    %32 = vector.broadcast %31 : vector<1x32xf32> to vector<32x32xf32>
    %33 = arith.addf %30, %32 : vector<32x32xf32>
    %cst_27 = arith.constant 5.65685415 : f32
    %34 = vector.broadcast %cst_27 : f32 to vector<32x32xf32>
    %35 = arith.mulf %33, %34 : vector<32x32xf32>
    %c0_28 = arith.constant 0 : index
    %c0_29 = arith.constant 0 : index
    %36 = vector.load %arg3[%c0_28, %c0_29] : memref<32x1xf32, #tpu.memory_space<vmem>>, vector<32x1xf32>
    %cst_30 = arith.constant 5.000000e-01 : f32
    %37 = vector.broadcast %cst_30 : f32 to vector<32x1xf32>
    %38 = arith.cmpf ogt, %36, %37 : vector<32x1xf32>
    %cst_31 = arith.constant 0.000000e+00 : f32
    %39 = vector.shape_cast %38 : vector<32x1xi1> to vector<32x1xi1>
    %40 = vector.broadcast %39 : vector<32x1xi1> to vector<32x32xi1>
    %41 = vector.broadcast %cst_31 : f32 to vector<32x32xf32>
    %42 = arith.select %40, %41, %35 : vector<32x32xi1>, vector<32x32xf32>
    %c0_32 = arith.constant 0 : index
    %c0_33 = arith.constant 0 : index
    %43 = vector.load %arg13[%c0_32, %c0_33] : memref<32x32xf32, #tpu.memory_space<vmem>>, vector<32x32xf32>
    tpu.vector_store %arg13[%c0_32, %c0_33], %42 {strides = array<i32>} : memref<32x32xf32, #tpu.memory_space<vmem>>, vector<32x32xf32>,
    return
  }
  func.func @transform_0(%arg0: i32) -> (i32, i32) {
    %c0_i32 = arith.constant 0 : i32
    %c0_i32_0 = arith.constant 0 : i32
    return %arg0, %c0_i32 : i32, i32
  }
  func.func @transform_1(%arg0: i32) -> (i32, i32) {
    %c0_i32 = arith.constant 0 : i32
    %c0_i32_0 = arith.constant 0 : i32
    return %arg0, %c0_i32 : i32, i32
  }
  func.func @transform_2(%arg0: i32) -> (i32, i32) {
    %c0_i32 = arith.constant 0 : i32
    %c0_i32_0 = arith.constant 0 : i32
    return %arg0, %c0_i32 : i32, i32
  }
  func.func @transform_3(%arg0: i32) -> (i32, i32) {
    %c0_i32 = arith.constant 0 : i32
    %c0_i32_0 = arith.constant 0 : i32
    %c0_i32_1 = arith.constant 0 : i32
    return %c0_i32, %c0_i32_0 : i32, i32
  }
  func.func @transform_4(%arg0: i32) -> (i32, i32) {
    %c0_i32 = arith.constant 0 : i32
    %c0_i32_0 = arith.constant 0 : i32
    %c0_i32_1 = arith.constant 0 : i32
    return %c0_i32, %c0_i32_0 : i32, i32
  }
  func.func @transform_5(%arg0: i32) -> (i32, i32) {
    %c0_i32 = arith.constant 0 : i32
    %c0_i32_0 = arith.constant 0 : i32
    %c0_i32_1 = arith.constant 0 : i32
    return %c0_i32, %c0_i32_0 : i32, i32
  }
  func.func @transform_6(%arg0: i32) -> (i32, i32) {
    %c0_i32 = arith.constant 0 : i32
    %c0_i32_0 = arith.constant 0 : i32
    %c0_i32_1 = arith.constant 0 : i32
    return %c0_i32, %c0_i32_0 : i32, i32
  }
  func.func @transform_7(%arg0: i32) -> (i32, i32) {
    %c0_i32 = arith.constant 0 : i32
    %c0_i32_0 = arith.constant 0 : i32
    %c0_i32_1 = arith.constant 0 : i32
    return %c0_i32, %c0_i32_0 : i32, i32
  }
  func.func @transform_8(%arg0: i32) -> (i32, i32) {
    %c0_i32 = arith.constant 0 : i32
    %c0_i32_0 = arith.constant 0 : i32
    %c0_i32_1 = arith.constant 0 : i32
    return %c0_i32, %c0_i32_0 : i32, i32
  }
  func.func @transform_9(%arg0: i32) -> (i32, i32) {
    %c0_i32 = arith.constant 0 : i32
    %c0_i32_0 = arith.constant 0 : i32
    %c0_i32_1 = arith.constant 0 : i32
    return %c0_i32, %c0_i32_0 : i32, i32
  }
  func.func @transform_10(%arg0: i32) -> (i32, i32) {
    %c0_i32 = arith.constant 0 : i32
    %c0_i32_0 = arith.constant 0 : i32
    %c0_i32_1 = arith.constant 0 : i32
    return %c0_i32, %c0_i32_0 : i32, i32
  }
  func.func @transform_11(%arg0: i32) -> (i32, i32) {
    %c0_i32 = arith.constant 0 : i32
    %c0_i32_0 = arith.constant 0 : i32
    %c0_i32_1 = arith.constant 0 : i32
    return %c0_i32, %c0_i32_0 : i32, i32
  }
  func.func @transform_12(%arg0: i32) -> (i32, i32) {
    %c0_i32 = arith.constant 0 : i32
    %c0_i32_0 = arith.constant 0 : i32
    return %arg0, %c0_i32 : i32, i32
  }
}

module attributes {stable_mosaic.version = 11 : i64} {
  func.func @_pnca_attn_kernel(%arg0: i32, %arg1: memref<2xi32, #tpu.memory_space<smem>>, %arg2: memref<1x16x96xbf16, #tpu.memory_space<vmem>>, %arg3: memref<1x16x64xbf16, #tpu.memory_space<vmem>>, %arg4: memref<1x16x32xf32, #tpu.memory_space<vmem>>, %arg5: memref<1x1x16xf32, #tpu.memory_space<vmem>>, %arg6: memref<1x16x1xf32, #tpu.memory_space<vmem>>, %arg7: memref<32x32xbf16, #tpu.memory_space<vmem>>, %arg8: memref<1x32xf32, #tpu.memory_space<vmem>>, %arg9: memref<32x32xbf16, #tpu.memory_space<vmem>>, %arg10: memref<1x32xf32, #tpu.memory_space<vmem>>, %arg11: memref<1x16x32xf32, #tpu.memory_space<vmem>>, %arg12: memref<1x2x16x16xf32, #tpu.memory_space<vmem>>, %arg13: memref<1x2x16x16xf32, #tpu.memory_space<vmem>>) attributes {dimension_semantics = [#tpu.dimension_semantics<parallel>], iteration_bounds = array<i64: 2>, scalar_prefetch = 1 : i64, scratch_operands = 0 : i64, tpu.core_type = #tpu.core_type<tc>, window_params = [{transform_indices = @transform_0, window_bounds = array<i64: 1, 16, 96>}, {transform_indices = @transform_1, window_bounds = array<i64: 1, 16, 64>}, {transform_indices = @transform_2, window_bounds = array<i64: 1, 16, 32>}, {transform_indices = @transform_3, window_bounds = array<i64: 1, 1, 16>}, {transform_indices = @transform_4, window_bounds = array<i64: 1, 16, 1>}, {pipeline_mode = #tpu.pipeline_mode<synchronous>, transform_indices = @transform_5, window_bounds = array<i64: 32, 32>}, {pipeline_mode = #tpu.pipeline_mode<synchronous>, transform_indices = @transform_6, window_bounds = array<i64: 1, 32>}, {pipeline_mode = #tpu.pipeline_mode<synchronous>, transform_indices = @transform_7, window_bounds = array<i64: 32, 32>}, {pipeline_mode = #tpu.pipeline_mode<synchronous>, transform_indices = @transform_8, window_bounds = array<i64: 1, 32>}, {transform_indices = @transform_9, window_bounds = array<i64: 1, 16, 32>}, {transform_indices = @transform_10, window_bounds = array<i64: 1, 2, 16, 16>}, {transform_indices = @transform_11, window_bounds = array<i64: 1, 2, 16, 16>}]} {
    %c0 = arith.constant 0 : index
    %c0_0 = arith.constant 0 : index
    %c0_1 = arith.constant 0 : index
    %0 = vector.load %arg2[%c0, %c0_0, %c0_1] : memref<1x16x96xbf16, #tpu.memory_space<vmem>>, vector<1x16x96xbf16>
    %1 = vector.shape_cast %0 : vector<1x16x96xbf16> to vector<16x96xbf16>
    %c0_2 = arith.constant 0 : index
    %c0_3 = arith.constant 0 : index
    %c0_4 = arith.constant 0 : index
    %2 = vector.load %arg3[%c0_2, %c0_3, %c0_4] : memref<1x16x64xbf16, #tpu.memory_space<vmem>>, vector<1x16x64xbf16>
    %3 = vector.shape_cast %2 : vector<1x16x64xbf16> to vector<16x64xbf16>
    %c0_5 = arith.constant 0 : index
    %c0_6 = arith.constant 0 : index
    %c0_7 = arith.constant 0 : index
    %4 = vector.load %arg4[%c0_5, %c0_6, %c0_7] : memref<1x16x32xf32, #tpu.memory_space<vmem>>, vector<1x16x32xf32>
    %5 = vector.shape_cast %4 : vector<1x16x32xf32> to vector<16x32xf32>
    %c0_8 = arith.constant 0 : index
    %c0_9 = arith.constant 0 : index
    %c0_10 = arith.constant 0 : index
    %6 = vector.load %arg5[%c0_8, %c0_9, %c0_10] : memref<1x1x16xf32, #tpu.memory_space<vmem>>, vector<1x1x16xf32>
    %7 = vector.shape_cast %6 : vector<1x1x16xf32> to vector<1x16xf32>
    %cst = arith.constant 5.000000e-01 : f32
    %8 = vector.broadcast %cst : f32 to vector<1x16xf32>
    %9 = arith.cmpf ogt, %7, %8 : vector<1x16xf32>
    %c0_11 = arith.constant 0 : index
    %c0_12 = arith.constant 0 : index
    %c0_13 = arith.constant 0 : index
    %10 = vector.load %arg6[%c0_11, %c0_12, %c0_13] : memref<1x16x1xf32, #tpu.memory_space<vmem>>, vector<1x16x1xf32>
    %11 = vector.shape_cast %10 : vector<1x16x1xf32> to vector<16x1xf32>
    %cst_14 = arith.constant 5.000000e-01 : f32
    %12 = vector.broadcast %cst_14 : f32 to vector<16x1xf32>
    %13 = arith.cmpf ogt, %11, %12 : vector<16x1xf32>
    %c0_15 = arith.constant 0 : index
    %14 = memref.load %arg1[%c0_15] : memref<2xi32, #tpu.memory_space<smem>>
    %c1 = arith.constant 1 : index
    %15 = memref.load %arg1[%c1] : memref<2xi32, #tpu.memory_space<smem>>
    %16 = tpu.iota {dimensions = array<i32: 0>} : vector<16x16xi32>
    %17 = tpu.iota {dimensions = array<i32: 1>} : vector<16x16xi32>
    %cst_16 = arith.constant dense<true> : vector<16x1xi1>
    %18 = arith.xori %13, %cst_16 : vector<16x1xi1>
    %19 = arith.cmpi sgt, %17, %16 : vector<16x16xi32>
    %20 = vector.broadcast %14 : i32 to vector<16x16xi32>
    %21 = arith.subi %16, %20 : vector<16x16xi32>
    %22 = arith.cmpi slt, %17, %21 : vector<16x16xi32>
    %23 = arith.ori %19, %22 : vector<16x16xi1>
    %24 = vector.broadcast %9 : vector<1x16xi1> to vector<16x16xi1>
    %25 = arith.ori %23, %24 : vector<16x16xi1>
    %26 = vector.broadcast %18 : vector<16x1xi1> to vector<16x16xi1>
    %27 = arith.andi %25, %26 : vector<16x16xi1>
    %28 = arith.cmpi slt, %17, %16 : vector<16x16xi32>
    %29 = vector.broadcast %15 : i32 to vector<16x16xi32>
    %30 = arith.addi %16, %29 : vector<16x16xi32>
    %31 = arith.cmpi sgt, %17, %30 : vector<16x16xi32>
    %32 = arith.ori %28, %31 : vector<16x16xi1>
    %33 = vector.broadcast %9 : vector<1x16xi1> to vector<16x16xi1>
    %34 = arith.ori %32, %33 : vector<16x16xi1>
    %35 = vector.broadcast %18 : vector<16x1xi1> to vector<16x16xi1>
    %36 = arith.andi %34, %35 : vector<16x16xi1>
    %37 = vector.extract_strided_slice %1 {offsets = [0, 0], sizes = [16, 32], strides = [1, 1]} : vector<16x96xbf16> to vector<16x32xbf16>
    %38 = vector.extract_strided_slice %1 {offsets = [0, 32], sizes = [16, 32], strides = [1, 1]} : vector<16x96xbf16> to vector<16x32xbf16>
    %39 = vector.extract_strided_slice %1 {offsets = [0, 64], sizes = [16, 32], strides = [1, 1]} : vector<16x96xbf16> to vector<16x32xbf16>
    %40 = vector.extract_strided_slice %3 {offsets = [0, 0], sizes = [16, 32], strides = [1, 1]} : vector<16x64xbf16> to vector<16x32xbf16>
    %41 = vector.extract_strided_slice %3 {offsets = [0, 32], sizes = [16, 32], strides = [1, 1]} : vector<16x64xbf16> to vector<16x32xbf16>
    %42 = vector.extract_strided_slice %37 {offsets = [0, 0], sizes = [16, 16], strides = [1, 1]} : vector<16x32xbf16> to vector<16x16xbf16>
    %43 = vector.extract_strided_slice %38 {offsets = [0, 0], sizes = [16, 16], strides = [1, 1]} : vector<16x32xbf16> to vector<16x16xbf16>
    %44 = vector.extract_strided_slice %39 {offsets = [0, 0], sizes = [16, 16], strides = [1, 1]} : vector<16x32xbf16> to vector<16x16xbf16>
    %cst_17 = arith.constant dense<0.000000e+00> : vector<16x16xf32>
    %45 = tpu.matmul %42, %43, %cst_17 {dimension_numbers = #tpu.dot_dimension_numbers<[1], [1], [0], [0], [0, 0, 1, 0], [], []>} : vector<16x16xbf16>, vector<16x16xbf16>, vector<16x16xf32> -> vector<16x16xf32>
    %cst_18 = arith.constant 2.500000e-01 : f32
    %46 = vector.broadcast %cst_18 : f32 to vector<16x16xf32>
    %47 = arith.mulf %45, %46 : vector<16x16xf32>
    %cst_19 = arith.constant -1.000000e+30 : f32
    %48 = vector.broadcast %cst_19 : f32 to vector<16x16xf32>
    %49 = arith.select %27, %48, %47 : vector<16x16xi1>, vector<16x16xf32>
    %cst_20 = arith.constant dense<0xFF800000> : vector<16xf32>
    %50 = vector.multi_reduction <maximumf>, %49, %cst_20 [1] : vector<16x16xf32> to vector<16xf32>
    %51 = vector.shape_cast %50 : vector<16xf32> to vector<16x1xf32>
    %52 = vector.broadcast %51 : vector<16x1xf32> to vector<16x16xf32>
    %53 = arith.subf %49, %52 : vector<16x16xf32>
    %54 = math.exp %53 : vector<16x16xf32>
    %cst_21 = arith.constant dense<0.000000e+00> : vector<16xf32>
    %55 = vector.multi_reduction <add>, %54, %cst_21 [1] : vector<16x16xf32> to vector<16xf32>
    %56 = vector.shape_cast %55 : vector<16xf32> to vector<16x1xf32>
    %57 = tpu.reciprocal %56 {approx = true} : vector<16x1xf32> -> vector<16x1xf32>
    %58 = vector.broadcast %57 : vector<16x1xf32> to vector<16x16xf32>
    %59 = arith.mulf %54, %58 : vector<16x16xf32>
    %60 = arith.truncf %59 : vector<16x16xf32> to vector<16x16xbf16>
    %cst_22 = arith.constant dense<0.000000e+00> : vector<16x16xf32>
    %61 = tpu.matmul %60, %44, %cst_22 {dimension_numbers = #tpu.dot_dimension_numbers<[1], [0], [0], [1], [0, 0, 1, 1], [], []>} : vector<16x16xbf16>, vector<16x16xbf16>, vector<16x16xf32> -> vector<16x16xf32>
    %62 = vector.extract_strided_slice %37 {offsets = [0, 0], sizes = [16, 16], strides = [1, 1]} : vector<16x32xbf16> to vector<16x16xbf16>
    %63 = vector.extract_strided_slice %40 {offsets = [0, 0], sizes = [16, 16], strides = [1, 1]} : vector<16x32xbf16> to vector<16x16xbf16>
    %64 = vector.extract_strided_slice %41 {offsets = [0, 0], sizes = [16, 16], strides = [1, 1]} : vector<16x32xbf16> to vector<16x16xbf16>
    %cst_23 = arith.constant dense<0.000000e+00> : vector<16x16xf32>
    %65 = tpu.matmul %62, %63, %cst_23 {dimension_numbers = #tpu.dot_dimension_numbers<[1], [1], [0], [0], [0, 0, 1, 0], [], []>} : vector<16x16xbf16>, vector<16x16xbf16>, vector<16x16xf32> -> vector<16x16xf32>
    %cst_24 = arith.constant 2.500000e-01 : f32
    %66 = vector.broadcast %cst_24 : f32 to vector<16x16xf32>
    %67 = arith.mulf %65, %66 : vector<16x16xf32>
    %cst_25 = arith.constant -1.000000e+30 : f32
    %68 = vector.broadcast %cst_25 : f32 to vector<16x16xf32>
    %69 = arith.select %36, %68, %67 : vector<16x16xi1>, vector<16x16xf32>
    %cst_26 = arith.constant dense<0xFF800000> : vector<16xf32>
    %70 = vector.multi_reduction <maximumf>, %69, %cst_26 [1] : vector<16x16xf32> to vector<16xf32>
    %71 = vector.shape_cast %70 : vector<16xf32> to vector<16x1xf32>
    %72 = vector.broadcast %71 : vector<16x1xf32> to vector<16x16xf32>
    %73 = arith.subf %69, %72 : vector<16x16xf32>
    %74 = math.exp %73 : vector<16x16xf32>
    %cst_27 = arith.constant dense<0.000000e+00> : vector<16xf32>
    %75 = vector.multi_reduction <add>, %74, %cst_27 [1] : vector<16x16xf32> to vector<16xf32>
    %76 = vector.shape_cast %75 : vector<16xf32> to vector<16x1xf32>
    %77 = tpu.reciprocal %76 {approx = true} : vector<16x1xf32> -> vector<16x1xf32>
    %78 = vector.broadcast %77 : vector<16x1xf32> to vector<16x16xf32>
    %79 = arith.mulf %74, %78 : vector<16x16xf32>
    %80 = arith.truncf %79 : vector<16x16xf32> to vector<16x16xbf16>
    %cst_28 = arith.constant dense<0.000000e+00> : vector<16x16xf32>
    %81 = tpu.matmul %80, %64, %cst_28 {dimension_numbers = #tpu.dot_dimension_numbers<[1], [0], [0], [1], [0, 0, 1, 1], [], []>} : vector<16x16xbf16>, vector<16x16xbf16>, vector<16x16xf32> -> vector<16x16xf32>
    %c0_29 = arith.constant 0 : index
    %c0_30 = arith.constant 0 : index
    %c0_31 = arith.constant 0 : index
    %c0_32 = arith.constant 0 : index
    %82 = vector.load %arg12[%c0_29, %c0_30, %c0_31, %c0_32] : memref<1x2x16x16xf32, #tpu.memory_space<vmem>>, vector<1x1x16x16xf32>
    %83 = vector.shape_cast %82 : vector<1x1x16x16xf32> to vector<16x16xf32>
    %84 = vector.shape_cast %59 : vector<16x16xf32> to vector<1x1x16x16xf32>
    tpu.vector_store %arg12[%c0_29, %c0_30, %c0_31, %c0_32], %84 {strides = array<i32>} : memref<1x2x16x16xf32, #tpu.memory_space<vmem>>, vector<1x1x16x16xf32>,
    %c0_33 = arith.constant 0 : index
    %c0_34 = arith.constant 0 : index
    %c0_35 = arith.constant 0 : index
    %c0_36 = arith.constant 0 : index
    %85 = vector.load %arg13[%c0_33, %c0_34, %c0_35, %c0_36] : memref<1x2x16x16xf32, #tpu.memory_space<vmem>>, vector<1x1x16x16xf32>
    %86 = vector.shape_cast %85 : vector<1x1x16x16xf32> to vector<16x16xf32>
    %87 = vector.shape_cast %79 : vector<16x16xf32> to vector<1x1x16x16xf32>
    tpu.vector_store %arg13[%c0_33, %c0_34, %c0_35, %c0_36], %87 {strides = array<i32>} : memref<1x2x16x16xf32, #tpu.memory_space<vmem>>, vector<1x1x16x16xf32>,
    %88 = vector.extract_strided_slice %37 {offsets = [0, 16], sizes = [16, 16], strides = [1, 1]} : vector<16x32xbf16> to vector<16x16xbf16>
    %89 = vector.extract_strided_slice %38 {offsets = [0, 16], sizes = [16, 16], strides = [1, 1]} : vector<16x32xbf16> to vector<16x16xbf16>
    %90 = vector.extract_strided_slice %39 {offsets = [0, 16], sizes = [16, 16], strides = [1, 1]} : vector<16x32xbf16> to vector<16x16xbf16>
    %cst_37 = arith.constant dense<0.000000e+00> : vector<16x16xf32>
    %91 = tpu.matmul %88, %89, %cst_37 {dimension_numbers = #tpu.dot_dimension_numbers<[1], [1], [0], [0], [0, 0, 1, 0], [], []>} : vector<16x16xbf16>, vector<16x16xbf16>, vector<16x16xf32> -> vector<16x16xf32>
    %cst_38 = arith.constant 2.500000e-01 : f32
    %92 = vector.broadcast %cst_38 : f32 to vector<16x16xf32>
    %93 = arith.mulf %91, %92 : vector<16x16xf32>
    %cst_39 = arith.constant -1.000000e+30 : f32
    %94 = vector.broadcast %cst_39 : f32 to vector<16x16xf32>
    %95 = arith.select %27, %94, %93 : vector<16x16xi1>, vector<16x16xf32>
    %cst_40 = arith.constant dense<0xFF800000> : vector<16xf32>
    %96 = vector.multi_reduction <maximumf>, %95, %cst_40 [1] : vector<16x16xf32> to vector<16xf32>
    %97 = vector.shape_cast %96 : vector<16xf32> to vector<16x1xf32>
    %98 = vector.broadcast %97 : vector<16x1xf32> to vector<16x16xf32>
    %99 = arith.subf %95, %98 : vector<16x16xf32>
    %100 = math.exp %99 : vector<16x16xf32>
    %cst_41 = arith.constant dense<0.000000e+00> : vector<16xf32>
    %101 = vector.multi_reduction <add>, %100, %cst_41 [1] : vector<16x16xf32> to vector<16xf32>
    %102 = vector.shape_cast %101 : vector<16xf32> to vector<16x1xf32>
    %103 = tpu.reciprocal %102 {approx = true} : vector<16x1xf32> -> vector<16x1xf32>
    %104 = vector.broadcast %103 : vector<16x1xf32> to vector<16x16xf32>
    %105 = arith.mulf %100, %104 : vector<16x16xf32>
    %106 = arith.truncf %105 : vector<16x16xf32> to vector<16x16xbf16>
    %cst_42 = arith.constant dense<0.000000e+00> : vector<16x16xf32>
    %107 = tpu.matmul %106, %90, %cst_42 {dimension_numbers = #tpu.dot_dimension_numbers<[1], [0], [0], [1], [0, 0, 1, 1], [], []>} : vector<16x16xbf16>, vector<16x16xbf16>, vector<16x16xf32> -> vector<16x16xf32>
    %108 = vector.extract_strided_slice %37 {offsets = [0, 16], sizes = [16, 16], strides = [1, 1]} : vector<16x32xbf16> to vector<16x16xbf16>
    %109 = vector.extract_strided_slice %40 {offsets = [0, 16], sizes = [16, 16], strides = [1, 1]} : vector<16x32xbf16> to vector<16x16xbf16>
    %110 = vector.extract_strided_slice %41 {offsets = [0, 16], sizes = [16, 16], strides = [1, 1]} : vector<16x32xbf16> to vector<16x16xbf16>
    %cst_43 = arith.constant dense<0.000000e+00> : vector<16x16xf32>
    %111 = tpu.matmul %108, %109, %cst_43 {dimension_numbers = #tpu.dot_dimension_numbers<[1], [1], [0], [0], [0, 0, 1, 0], [], []>} : vector<16x16xbf16>, vector<16x16xbf16>, vector<16x16xf32> -> vector<16x16xf32>
    %cst_44 = arith.constant 2.500000e-01 : f32
    %112 = vector.broadcast %cst_44 : f32 to vector<16x16xf32>
    %113 = arith.mulf %111, %112 : vector<16x16xf32>
    %cst_45 = arith.constant -1.000000e+30 : f32
    %114 = vector.broadcast %cst_45 : f32 to vector<16x16xf32>
    %115 = arith.select %36, %114, %113 : vector<16x16xi1>, vector<16x16xf32>
    %cst_46 = arith.constant dense<0xFF800000> : vector<16xf32>
    %116 = vector.multi_reduction <maximumf>, %115, %cst_46 [1] : vector<16x16xf32> to vector<16xf32>
    %117 = vector.shape_cast %116 : vector<16xf32> to vector<16x1xf32>
    %118 = vector.broadcast %117 : vector<16x1xf32> to vector<16x16xf32>
    %119 = arith.subf %115, %118 : vector<16x16xf32>
    %120 = math.exp %119 : vector<16x16xf32>
    %cst_47 = arith.constant dense<0.000000e+00> : vector<16xf32>
    %121 = vector.multi_reduction <add>, %120, %cst_47 [1] : vector<16x16xf32> to vector<16xf32>
    %122 = vector.shape_cast %121 : vector<16xf32> to vector<16x1xf32>
    %123 = tpu.reciprocal %122 {approx = true} : vector<16x1xf32> -> vector<16x1xf32>
    %124 = vector.broadcast %123 : vector<16x1xf32> to vector<16x16xf32>
    %125 = arith.mulf %120, %124 : vector<16x16xf32>
    %126 = arith.truncf %125 : vector<16x16xf32> to vector<16x16xbf16>
    %cst_48 = arith.constant dense<0.000000e+00> : vector<16x16xf32>
    %127 = tpu.matmul %126, %110, %cst_48 {dimension_numbers = #tpu.dot_dimension_numbers<[1], [0], [0], [1], [0, 0, 1, 1], [], []>} : vector<16x16xbf16>, vector<16x16xbf16>, vector<16x16xf32> -> vector<16x16xf32>
    %c0_49 = arith.constant 0 : index
    %c1_50 = arith.constant 1 : index
    %c0_51 = arith.constant 0 : index
    %c0_52 = arith.constant 0 : index
    %128 = vector.load %arg12[%c0_49, %c1_50, %c0_51, %c0_52] : memref<1x2x16x16xf32, #tpu.memory_space<vmem>>, vector<1x1x16x16xf32>
    %129 = vector.shape_cast %128 : vector<1x1x16x16xf32> to vector<16x16xf32>
    %130 = vector.shape_cast %105 : vector<16x16xf32> to vector<1x1x16x16xf32>
    tpu.vector_store %arg12[%c0_49, %c1_50, %c0_51, %c0_52], %130 {strides = array<i32>} : memref<1x2x16x16xf32, #tpu.memory_space<vmem>>, vector<1x1x16x16xf32>,
    %c0_53 = arith.constant 0 : index
    %c1_54 = arith.constant 1 : index
    %c0_55 = arith.constant 0 : index
    %c0_56 = arith.constant 0 : index
    %131 = vector.load %arg13[%c0_53, %c1_54, %c0_55, %c0_56] : memref<1x2x16x16xf32, #tpu.memory_space<vmem>>, vector<1x1x16x16xf32>
    %132 = vector.shape_cast %131 : vector<1x1x16x16xf32> to vector<16x16xf32>
    %133 = vector.shape_cast %125 : vector<16x16xf32> to vector<1x1x16x16xf32>
    tpu.vector_store %arg13[%c0_53, %c1_54, %c0_55, %c0_56], %133 {strides = array<i32>} : memref<1x2x16x16xf32, #tpu.memory_space<vmem>>, vector<1x1x16x16xf32>,
    %134 = tpu.concatenate %61, %107 in 1 : vector<16x16xf32>, vector<16x16xf32> -> vector<16x32xf32>
    %135 = tpu.concatenate %81, %127 in 1 : vector<16x16xf32>, vector<16x16xf32> -> vector<16x32xf32>
    %c0_57 = arith.constant 0 : index
    %c0_58 = arith.constant 0 : index
    %136 = vector.load %arg7[%c0_57, %c0_58] : memref<32x32xbf16, #tpu.memory_space<vmem>>, vector<32x32xbf16>
    %c0_59 = arith.constant 0 : index
    %c0_60 = arith.constant 0 : index
    %137 = vector.load %arg8[%c0_59, %c0_60] : memref<1x32xf32, #tpu.memory_space<vmem>>, vector<1x32xf32>
    %138 = arith.truncf %134 : vector<16x32xf32> to vector<16x32xbf16>
    %cst_61 = arith.constant dense<0.000000e+00> : vector<16x32xf32>
    %139 = tpu.matmul %138, %136, %cst_61 {dimension_numbers = #tpu.dot_dimension_numbers<[1], [0], [0], [1], [0, 0, 1, 1], [], []>} : vector<16x32xbf16>, vector<32x32xbf16>, vector<16x32xf32> -> vector<16x32xf32>
    %140 = vector.broadcast %137 : vector<1x32xf32> to vector<16x32xf32>
    %141 = arith.addf %139, %140 : vector<16x32xf32>
    %c0_62 = arith.constant 0 : index
    %c0_63 = arith.constant 0 : index
    %142 = vector.load %arg9[%c0_62, %c0_63] : memref<32x32xbf16, #tpu.memory_space<vmem>>, vector<32x32xbf16>
    %c0_64 = arith.constant 0 : index
    %c0_65 = arith.constant 0 : index
    %143 = vector.load %arg10[%c0_64, %c0_65] : memref<1x32xf32, #tpu.memory_space<vmem>>, vector<1x32xf32>
    %144 = arith.truncf %135 : vector<16x32xf32> to vector<16x32xbf16>
    %cst_66 = arith.constant dense<0.000000e+00> : vector<16x32xf32>
    %145 = tpu.matmul %144, %142, %cst_66 {dimension_numbers = #tpu.dot_dimension_numbers<[1], [0], [0], [1], [0, 0, 1, 1], [], []>} : vector<16x32xbf16>, vector<32x32xbf16>, vector<16x32xf32> -> vector<16x32xf32>
    %146 = vector.broadcast %143 : vector<1x32xf32> to vector<16x32xf32>
    %147 = arith.addf %145, %146 : vector<16x32xf32>
    %148 = arith.addf %141, %147 : vector<16x32xf32>
    %149 = arith.addf %148, %5 : vector<16x32xf32>
    %cst_67 = arith.constant 0.000000e+00 : f32
    %150 = vector.shape_cast %13 : vector<16x1xi1> to vector<16x1xi1>
    %151 = vector.broadcast %150 : vector<16x1xi1> to vector<16x32xi1>
    %152 = vector.broadcast %cst_67 : f32 to vector<16x32xf32>
    %153 = arith.select %151, %152, %149 : vector<16x32xi1>, vector<16x32xf32>
    %c0_68 = arith.constant 0 : index
    %c0_69 = arith.constant 0 : index
    %c0_70 = arith.constant 0 : index
    %154 = vector.load %arg11[%c0_68, %c0_69, %c0_70] : memref<1x16x32xf32, #tpu.memory_space<vmem>>, vector<1x16x32xf32>
    %155 = vector.shape_cast %154 : vector<1x16x32xf32> to vector<16x32xf32>
    %156 = vector.shape_cast %153 : vector<16x32xf32> to vector<1x16x32xf32>
    tpu.vector_store %arg11[%c0_68, %c0_69, %c0_70], %156 {strides = array<i32>} : memref<1x16x32xf32, #tpu.memory_space<vmem>>, vector<1x16x32xf32>,
    return
  }
  func.func @transform_0(%arg0: i32, %arg1: memref<2xi32, #tpu.memory_space<smem>>) -> (i32, i32, i32) {
    %c0_i32 = arith.constant 0 : i32
    %c0_i32_0 = arith.constant 0 : i32
    %c0_i32_1 = arith.constant 0 : i32
    return %arg0, %c0_i32, %c0_i32_0 : i32, i32, i32
  }
  func.func @transform_1(%arg0: i32, %arg1: memref<2xi32, #tpu.memory_space<smem>>) -> (i32, i32, i32) {
    %c0_i32 = arith.constant 0 : i32
    %c0_i32_0 = arith.constant 0 : i32
    %c0_i32_1 = arith.constant 0 : i32
    return %arg0, %c0_i32, %c0_i32_0 : i32, i32, i32
  }
  func.func @transform_2(%arg0: i32, %arg1: memref<2xi32, #tpu.memory_space<smem>>) -> (i32, i32, i32) {
    %c0_i32 = arith.constant 0 : i32
    %c0_i32_0 = arith.constant 0 : i32
    %c0_i32_1 = arith.constant 0 : i32
    return %arg0, %c0_i32, %c0_i32_0 : i32, i32, i32
  }
  func.func @transform_3(%arg0: i32, %arg1: memref<2xi32, #tpu.memory_space<smem>>) -> (i32, i32, i32) {
    %c0_i32 = arith.constant 0 : i32
    %c0_i32_0 = arith.constant 0 : i32
    %c0_i32_1 = arith.constant 0 : i32
    return %arg0, %c0_i32, %c0_i32_0 : i32, i32, i32
  }
  func.func @transform_4(%arg0: i32, %arg1: memref<2xi32, #tpu.memory_space<smem>>) -> (i32, i32, i32) {
    %c0_i32 = arith.constant 0 : i32
    %c0_i32_0 = arith.constant 0 : i32
    %c0_i32_1 = arith.constant 0 : i32
    return %arg0, %c0_i32, %c0_i32_0 : i32, i32, i32
  }
  func.func @transform_5(%arg0: i32, %arg1: memref<2xi32, #tpu.memory_space<smem>>) -> (i32, i32) {
    %c0_i32 = arith.constant 0 : i32
    %c0_i32_0 = arith.constant 0 : i32
    %c0_i32_1 = arith.constant 0 : i32
    return %c0_i32, %c0_i32_0 : i32, i32
  }
  func.func @transform_6(%arg0: i32, %arg1: memref<2xi32, #tpu.memory_space<smem>>) -> (i32, i32) {
    %c0_i32 = arith.constant 0 : i32
    %c0_i32_0 = arith.constant 0 : i32
    %c0_i32_1 = arith.constant 0 : i32
    return %c0_i32, %c0_i32_0 : i32, i32
  }
  func.func @transform_7(%arg0: i32, %arg1: memref<2xi32, #tpu.memory_space<smem>>) -> (i32, i32) {
    %c0_i32 = arith.constant 0 : i32
    %c0_i32_0 = arith.constant 0 : i32
    %c0_i32_1 = arith.constant 0 : i32
    return %c0_i32, %c0_i32_0 : i32, i32
  }
  func.func @transform_8(%arg0: i32, %arg1: memref<2xi32, #tpu.memory_space<smem>>) -> (i32, i32) {
    %c0_i32 = arith.constant 0 : i32
    %c0_i32_0 = arith.constant 0 : i32
    %c0_i32_1 = arith.constant 0 : i32
    return %c0_i32, %c0_i32_0 : i32, i32
  }
  func.func @transform_9(%arg0: i32, %arg1: memref<2xi32, #tpu.memory_space<smem>>) -> (i32, i32, i32) {
    %c0_i32 = arith.constant 0 : i32
    %c0_i32_0 = arith.constant 0 : i32
    %c0_i32_1 = arith.constant 0 : i32
    return %arg0, %c0_i32, %c0_i32_0 : i32, i32, i32
  }
  func.func @transform_10(%arg0: i32, %arg1: memref<2xi32, #tpu.memory_space<smem>>) -> (i32, i32, i32, i32) {
    %c0_i32 = arith.constant 0 : i32
    %c0_i32_0 = arith.constant 0 : i32
    %c0_i32_1 = arith.constant 0 : i32
    %c0_i32_2 = arith.constant 0 : i32
    return %arg0, %c0_i32, %c0_i32_0, %c0_i32_1 : i32, i32, i32, i32
  }
  func.func @transform_11(%arg0: i32, %arg1: memref<2xi32, #tpu.memory_space<smem>>) -> (i32, i32, i32, i32) {
    %c0_i32 = arith.constant 0 : i32
    %c0_i32_0 = arith.constant 0 : i32
    %c0_i32_1 = arith.constant 0 : i32
    %c0_i32_2 = arith.constant 0 : i32
    return %arg0, %c0_i32, %c0_i32_0, %c0_i32_1 : i32, i32, i32, i32
  }
}

module attributes {stable_mosaic.version = 11 : i64} {
  func.func @_ffn_kernel(%arg0: i32, %arg1: memref<32x32xf32, #tpu.memory_space<vmem>>, %arg2: memref<32x1xf32, #tpu.memory_space<vmem>>, %arg3: memref<1x32xf32, #tpu.memory_space<vmem>>, %arg4: memref<1x32xf32, #tpu.memory_space<vmem>>, %arg5: memref<32x64xbf16, #tpu.memory_space<vmem>>, %arg6: memref<1x64xf32, #tpu.memory_space<vmem>>, %arg7: memref<64x32xbf16, #tpu.memory_space<vmem>>, %arg8: memref<1x32xf32, #tpu.memory_space<vmem>>, %arg9: memref<32x32xf32, #tpu.memory_space<vmem>>) attributes {dimension_semantics = [#tpu.dimension_semantics<parallel>], iteration_bounds = array<i64: 1>, scalar_prefetch = 0 : i64, scratch_operands = 0 : i64, tpu.core_type = #tpu.core_type<tc>, window_params = [{transform_indices = @transform_0, window_bounds = array<i64: 32, 32>}, {transform_indices = @transform_1, window_bounds = array<i64: 32, 1>}, {pipeline_mode = #tpu.pipeline_mode<synchronous>, transform_indices = @transform_2, window_bounds = array<i64: 1, 32>}, {pipeline_mode = #tpu.pipeline_mode<synchronous>, transform_indices = @transform_3, window_bounds = array<i64: 1, 32>}, {pipeline_mode = #tpu.pipeline_mode<synchronous>, transform_indices = @transform_4, window_bounds = array<i64: 32, 64>}, {pipeline_mode = #tpu.pipeline_mode<synchronous>, transform_indices = @transform_5, window_bounds = array<i64: 1, 64>}, {pipeline_mode = #tpu.pipeline_mode<synchronous>, transform_indices = @transform_6, window_bounds = array<i64: 64, 32>}, {pipeline_mode = #tpu.pipeline_mode<synchronous>, transform_indices = @transform_7, window_bounds = array<i64: 1, 32>}, {transform_indices = @transform_8, window_bounds = array<i64: 32, 32>}]} {
    %c0 = arith.constant 0 : index
    %c0_0 = arith.constant 0 : index
    %0 = vector.load %arg1[%c0, %c0_0] : memref<32x32xf32, #tpu.memory_space<vmem>>, vector<32x32xf32>
    %c0_1 = arith.constant 0 : index
    %c0_2 = arith.constant 0 : index
    %1 = vector.load %arg3[%c0_1, %c0_2] : memref<1x32xf32, #tpu.memory_space<vmem>>, vector<1x32xf32>
    %c0_3 = arith.constant 0 : index
    %c0_4 = arith.constant 0 : index
    %2 = vector.load %arg4[%c0_3, %c0_4] : memref<1x32xf32, #tpu.memory_space<vmem>>, vector<1x32xf32>
    %cst = arith.constant dense<0.000000e+00> : vector<32xf32>
    %3 = vector.multi_reduction <add>, %0, %cst [1] : vector<32x32xf32> to vector<32xf32>
    %4 = vector.shape_cast %3 : vector<32xf32> to vector<32x1xf32>
    %cst_5 = arith.constant 3.200000e+01 : f32
    %5 = vector.broadcast %cst_5 : f32 to vector<32x1xf32>
    %6 = arith.divf %4, %5 : vector<32x1xf32>
    %7 = vector.broadcast %6 : vector<32x1xf32> to vector<32x32xf32>
    %8 = arith.subf %0, %7 : vector<32x32xf32>
    %9 = arith.mulf %8, %8 : vector<32x32xf32>
    %cst_6 = arith.constant dense<0.000000e+00> : vector<32xf32>
    %10 = vector.multi_reduction <add>, %9, %cst_6 [1] : vector<32x32xf32> to vector<32xf32>
    %11 = vector.shape_cast %10 : vector<32xf32> to vector<32x1xf32>
    %cst_7 = arith.constant 3.200000e+01 : f32
    %12 = vector.broadcast %cst_7 : f32 to vector<32x1xf32>
    %13 = arith.divf %11, %12 : vector<32x1xf32>
    %cst_8 = arith.constant 9.99999997E-7 : f32
    %14 = vector.broadcast %cst_8 : f32 to vector<32x1xf32>
    %15 = arith.addf %13, %14 : vector<32x1xf32>
    %16 = math.rsqrt %15 : vector<32x1xf32>
    %17 = vector.broadcast %16 : vector<32x1xf32> to vector<32x32xf32>
    %18 = arith.mulf %8, %17 : vector<32x32xf32>
    %19 = vector.broadcast %1 : vector<1x32xf32> to vector<32x32xf32>
    %20 = arith.mulf %18, %19 : vector<32x32xf32>
    %21 = vector.broadcast %2 : vector<1x32xf32> to vector<32x32xf32>
    %22 = arith.addf %20, %21 : vector<32x32xf32>
    %c0_9 = arith.constant 0 : index
    %c0_10 = arith.constant 0 : index
    %23 = vector.load %arg5[%c0_9, %c0_10] : memref<32x64xbf16, #tpu.memory_space<vmem>>, vector<32x64xbf16>
    %c0_11 = arith.constant 0 : index
    %c0_12 = arith.constant 0 : index
    %24 = vector.load %arg6[%c0_11, %c0_12] : memref<1x64xf32, #tpu.memory_space<vmem>>, vector<1x64xf32>
    %25 = arith.truncf %22 : vector<32x32xf32> to vector<32x32xbf16>
    %cst_13 = arith.constant dense<0.000000e+00> : vector<32x64xf32>
    %26 = tpu.matmul %25, %23, %cst_13 {dimension_numbers = #tpu.dot_dimension_numbers<[1], [0], [0], [1], [0, 0, 1, 1], [], []>} : vector<32x32xbf16>, vector<32x64xbf16>, vector<32x64xf32> -> vector<32x64xf32>
    %27 = vector.broadcast %24 : vector<1x64xf32> to vector<32x64xf32>
    %28 = arith.addf %26, %27 : vector<32x64xf32>
    %cst_14 = arith.constant 0.000000e+00 : f32
    %29 = vector.broadcast %cst_14 : f32 to vector<32x64xf32>
    %30 = arith.maximumf %28, %29 : vector<32x64xf32>
    %c0_15 = arith.constant 0 : index
    %c0_16 = arith.constant 0 : index
    %31 = vector.load %arg7[%c0_15, %c0_16] : memref<64x32xbf16, #tpu.memory_space<vmem>>, vector<64x32xbf16>
    %c0_17 = arith.constant 0 : index
    %c0_18 = arith.constant 0 : index
    %32 = vector.load %arg8[%c0_17, %c0_18] : memref<1x32xf32, #tpu.memory_space<vmem>>, vector<1x32xf32>
    %33 = arith.truncf %30 : vector<32x64xf32> to vector<32x64xbf16>
    %cst_19 = arith.constant dense<0.000000e+00> : vector<32x32xf32>
    %34 = tpu.matmul %33, %31, %cst_19 {dimension_numbers = #tpu.dot_dimension_numbers<[1], [0], [0], [1], [0, 0, 1, 1], [], []>} : vector<32x64xbf16>, vector<64x32xbf16>, vector<32x32xf32> -> vector<32x32xf32>
    %35 = vector.broadcast %32 : vector<1x32xf32> to vector<32x32xf32>
    %36 = arith.addf %34, %35 : vector<32x32xf32>
    %37 = arith.addf %36, %0 : vector<32x32xf32>
    %c0_20 = arith.constant 0 : index
    %c0_21 = arith.constant 0 : index
    %38 = vector.load %arg2[%c0_20, %c0_21] : memref<32x1xf32, #tpu.memory_space<vmem>>, vector<32x1xf32>
    %cst_22 = arith.constant 5.000000e-01 : f32
    %39 = vector.broadcast %cst_22 : f32 to vector<32x1xf32>
    %40 = arith.cmpf ogt, %38, %39 : vector<32x1xf32>
    %cst_23 = arith.constant 0.000000e+00 : f32
    %41 = vector.shape_cast %40 : vector<32x1xi1> to vector<32x1xi1>
    %42 = vector.broadcast %41 : vector<32x1xi1> to vector<32x32xi1>
    %43 = vector.broadcast %cst_23 : f32 to vector<32x32xf32>
    %44 = arith.select %42, %43, %37 : vector<32x32xi1>, vector<32x32xf32>
    %c0_24 = arith.constant 0 : index
    %c0_25 = arith.constant 0 : index
    %45 = vector.load %arg9[%c0_24, %c0_25] : memref<32x32xf32, #tpu.memory_space<vmem>>, vector<32x32xf32>
    tpu.vector_store %arg9[%c0_24, %c0_25], %44 {strides = array<i32>} : memref<32x32xf32, #tpu.memory_space<vmem>>, vector<32x32xf32>,
    return
  }
  func.func @transform_0(%arg0: i32) -> (i32, i32) {
    %c0_i32 = arith.constant 0 : i32
    %c0_i32_0 = arith.constant 0 : i32
    return %arg0, %c0_i32 : i32, i32
  }
  func.func @transform_1(%arg0: i32) -> (i32, i32) {
    %c0_i32 = arith.constant 0 : i32
    %c0_i32_0 = arith.constant 0 : i32
    return %arg0, %c0_i32 : i32, i32
  }
  func.func @transform_2(%arg0: i32) -> (i32, i32) {
    %c0_i32 = arith.constant 0 : i32
    %c0_i32_0 = arith.constant 0 : i32
    %c0_i32_1 = arith.constant 0 : i32
    return %c0_i32, %c0_i32_0 : i32, i32
  }
  func.func @transform_3(%arg0: i32) -> (i32, i32) {
    %c0_i32 = arith.constant 0 : i32
    %c0_i32_0 = arith.constant 0 : i32
    %c0_i32_1 = arith.constant 0 : i32
    return %c0_i32, %c0_i32_0 : i32, i32
  }
  func.func @transform_4(%arg0: i32) -> (i32, i32) {
    %c0_i32 = arith.constant 0 : i32
    %c0_i32_0 = arith.constant 0 : i32
    %c0_i32_1 = arith.constant 0 : i32
    return %c0_i32, %c0_i32_0 : i32, i32
  }
  func.func @transform_5(%arg0: i32) -> (i32, i32) {
    %c0_i32 = arith.constant 0 : i32
    %c0_i32_0 = arith.constant 0 : i32
    %c0_i32_1 = arith.constant 0 : i32
    return %c0_i32, %c0_i32_0 : i32, i32
  }
  func.func @transform_6(%arg0: i32) -> (i32, i32) {
    %c0_i32 = arith.constant 0 : i32
    %c0_i32_0 = arith.constant 0 : i32
    %c0_i32_1 = arith.constant 0 : i32
    return %c0_i32, %c0_i32_0 : i32, i32
  }
  func.func @transform_7(%arg0: i32) -> (i32, i32) {
    %c0_i32 = arith.constant 0 : i32
    %c0_i32_0 = arith.constant 0 : i32
    %c0_i32_1 = arith.constant 0 : i32
    return %c0_i32, %c0_i32_0 : i32, i32
  }
  func.func @transform_8(%arg0: i32) -> (i32, i32) {
    %c0_i32 = arith.constant 0 : i32
    %c0_i32_0 = arith.constant 0 : i32
    return %arg0, %c0_i32 : i32, i32
  }
}

module attributes {stable_mosaic.version = 11 : i64} {
  func.func @_out_kernel(%arg0: i32, %arg1: memref<32x32xf32, #tpu.memory_space<vmem>>, %arg2: memref<1x32xf32, #tpu.memory_space<vmem>>, %arg3: memref<1x32xf32, #tpu.memory_space<vmem>>, %arg4: memref<32x8xbf16, #tpu.memory_space<vmem>>, %arg5: memref<1x8xf32, #tpu.memory_space<vmem>>, %arg6: memref<32x8xf32, #tpu.memory_space<vmem>>) attributes {dimension_semantics = [#tpu.dimension_semantics<parallel>], iteration_bounds = array<i64: 1>, scalar_prefetch = 0 : i64, scratch_operands = 0 : i64, tpu.core_type = #tpu.core_type<tc>, window_params = [{transform_indices = @transform_0, window_bounds = array<i64: 32, 32>}, {pipeline_mode = #tpu.pipeline_mode<synchronous>, transform_indices = @transform_1, window_bounds = array<i64: 1, 32>}, {pipeline_mode = #tpu.pipeline_mode<synchronous>, transform_indices = @transform_2, window_bounds = array<i64: 1, 32>}, {pipeline_mode = #tpu.pipeline_mode<synchronous>, transform_indices = @transform_3, window_bounds = array<i64: 32, 8>}, {pipeline_mode = #tpu.pipeline_mode<synchronous>, transform_indices = @transform_4, window_bounds = array<i64: 1, 8>}, {transform_indices = @transform_5, window_bounds = array<i64: 32, 8>}]} {
    %c0 = arith.constant 0 : index
    %c0_0 = arith.constant 0 : index
    %0 = vector.load %arg1[%c0, %c0_0] : memref<32x32xf32, #tpu.memory_space<vmem>>, vector<32x32xf32>
    %c0_1 = arith.constant 0 : index
    %c0_2 = arith.constant 0 : index
    %1 = vector.load %arg2[%c0_1, %c0_2] : memref<1x32xf32, #tpu.memory_space<vmem>>, vector<1x32xf32>
    %c0_3 = arith.constant 0 : index
    %c0_4 = arith.constant 0 : index
    %2 = vector.load %arg3[%c0_3, %c0_4] : memref<1x32xf32, #tpu.memory_space<vmem>>, vector<1x32xf32>
    %cst = arith.constant dense<0.000000e+00> : vector<32xf32>
    %3 = vector.multi_reduction <add>, %0, %cst [1] : vector<32x32xf32> to vector<32xf32>
    %4 = vector.shape_cast %3 : vector<32xf32> to vector<32x1xf32>
    %cst_5 = arith.constant 3.200000e+01 : f32
    %5 = vector.broadcast %cst_5 : f32 to vector<32x1xf32>
    %6 = arith.divf %4, %5 : vector<32x1xf32>
    %7 = vector.broadcast %6 : vector<32x1xf32> to vector<32x32xf32>
    %8 = arith.subf %0, %7 : vector<32x32xf32>
    %9 = arith.mulf %8, %8 : vector<32x32xf32>
    %cst_6 = arith.constant dense<0.000000e+00> : vector<32xf32>
    %10 = vector.multi_reduction <add>, %9, %cst_6 [1] : vector<32x32xf32> to vector<32xf32>
    %11 = vector.shape_cast %10 : vector<32xf32> to vector<32x1xf32>
    %cst_7 = arith.constant 3.200000e+01 : f32
    %12 = vector.broadcast %cst_7 : f32 to vector<32x1xf32>
    %13 = arith.divf %11, %12 : vector<32x1xf32>
    %cst_8 = arith.constant 9.99999997E-7 : f32
    %14 = vector.broadcast %cst_8 : f32 to vector<32x1xf32>
    %15 = arith.addf %13, %14 : vector<32x1xf32>
    %16 = math.rsqrt %15 : vector<32x1xf32>
    %17 = vector.broadcast %16 : vector<32x1xf32> to vector<32x32xf32>
    %18 = arith.mulf %8, %17 : vector<32x32xf32>
    %19 = vector.broadcast %1 : vector<1x32xf32> to vector<32x32xf32>
    %20 = arith.mulf %18, %19 : vector<32x32xf32>
    %21 = vector.broadcast %2 : vector<1x32xf32> to vector<32x32xf32>
    %22 = arith.addf %20, %21 : vector<32x32xf32>
    %c0_9 = arith.constant 0 : index
    %c0_10 = arith.constant 0 : index
    %23 = vector.load %arg4[%c0_9, %c0_10] : memref<32x8xbf16, #tpu.memory_space<vmem>>, vector<32x8xbf16>
    %c0_11 = arith.constant 0 : index
    %c0_12 = arith.constant 0 : index
    %24 = vector.load %arg5[%c0_11, %c0_12] : memref<1x8xf32, #tpu.memory_space<vmem>>, vector<1x8xf32>
    %25 = arith.truncf %22 : vector<32x32xf32> to vector<32x32xbf16>
    %cst_13 = arith.constant dense<0.000000e+00> : vector<32x8xf32>
    %26 = tpu.matmul %25, %23, %cst_13 {dimension_numbers = #tpu.dot_dimension_numbers<[1], [0], [0], [1], [0, 0, 1, 1], [], []>} : vector<32x32xbf16>, vector<32x8xbf16>, vector<32x8xf32> -> vector<32x8xf32>
    %27 = vector.broadcast %24 : vector<1x8xf32> to vector<32x8xf32>
    %28 = arith.addf %26, %27 : vector<32x8xf32>
    %c0_14 = arith.constant 0 : index
    %c0_15 = arith.constant 0 : index
    %29 = vector.load %arg6[%c0_14, %c0_15] : memref<32x8xf32, #tpu.memory_space<vmem>>, vector<32x8xf32>
    tpu.vector_store %arg6[%c0_14, %c0_15], %28 {strides = array<i32>} : memref<32x8xf32, #tpu.memory_space<vmem>>, vector<32x8xf32>,
    return
  }
  func.func @transform_0(%arg0: i32) -> (i32, i32) {
    %c0_i32 = arith.constant 0 : i32
    %c0_i32_0 = arith.constant 0 : i32
    return %arg0, %c0_i32 : i32, i32
  }
  func.func @transform_1(%arg0: i32) -> (i32, i32) {
    %c0_i32 = arith.constant 0 : i32
    %c0_i32_0 = arith.constant 0 : i32
    %c0_i32_1 = arith.constant 0 : i32
    return %c0_i32, %c0_i32_0 : i32, i32
  }
  func.func @transform_2(%arg0: i32) -> (i32, i32) {
    %c0_i32 = arith.constant 0 : i32
    %c0_i32_0 = arith.constant 0 : i32
    %c0_i32_1 = arith.constant 0 : i32
    return %c0_i32, %c0_i32_0 : i32, i32
  }
  func.func @transform_3(%arg0: i32) -> (i32, i32) {
    %c0_i32 = arith.constant 0 : i32
    %c0_i32_0 = arith.constant 0 : i32
    %c0_i32_1 = arith.constant 0 : i32
    return %c0_i32, %c0_i32_0 : i32, i32
  }
  func.func @transform_4(%arg0: i32) -> (i32, i32) {
    %c0_i32 = arith.constant 0 : i32
    %c0_i32_0 = arith.constant 0 : i32
    %c0_i32_1 = arith.constant 0 : i32
    return %c0_i32, %c0_i32_0 : i32, i32
  }
  func.func @transform_5(%arg0: i32) -> (i32, i32) {
    %c0_i32 = arith.constant 0 : i32
    %c0_i32_0 = arith.constant 0 : i32
    return %arg0, %c0_i32 : i32, i32
  }
}

</mosaic_0001>

<bundles_post_ra>
// kernel: hybrid_attention_decoder_forward.8
= control target key start
LH: loop header
LB: loop body
LE: loop exit
PB: predicated region body
PF: predicated region fallthrough
CT: control target
= control target key end

     0   :  { %vm63_vm0 = vcmask 1043456   ;;  %vm56_vm1 = vcmask 64512   ;;  %vm145_vm2 = vcmask 261120   ;;  %v585_v45 = vmov 0   ;;  %s750_s3 = inlined_call_operand.vmem [shape: bf16[8,32], index: 3, kind: input, shape index: {}]   ;;  %s751_s0 = inlined_call_operand.vmem [shape: f32[32,8], index: 0, kind: input, shape index: {}]   ;;  %s752_s5 = inlined_call_operand.vmem [shape: bf16[32,32], index: 5, kind: input, shape index: {}]   ;;  %s753_s4 = inlined_call_operand.vmem [shape: f32[1,32], index: 4, kind: input, shape index: {}]   ;;  %s754_s7 = inlined_call_operand.vmem [shape: bf16[32,32], index: 7, kind: input, shape index: {}]   ;;  %s755_s6 = inlined_call_operand.vmem [shape: f32[1,32], index: 6, kind: input, shape index: {}]   ;;  %s756_s10 = inlined_call_operand.vmem [shape: bf16[32,32], index: 10, kind: input, shape index: {}]   ;;  %s757_s9 = inlined_call_operand.vmem [shape: bf16[32,32], index: 9, kind: input, shape index: {}]   ;;  %s758_s2 = inlined_call_operand.vmem [shape: f32[32,1], index: 2, kind: input, shape index: {}]   ;;  %s759_s8 = inlined_call_operand.vmem [shape: f32[1,32], index: 8, kind: input, shape index: {}]   ;;  %s760_s1 = inlined_call_operand.vmem [shape: f32[32,32], index: 1, kind: input, shape index: {}]   ;;  %s761_s11 = inlined_call_operand.vmem [shape: f32[1,32], index: 11, kind: input, shape index: {}]   ;;  %s762_s12 = inlined_call_operand.vmem [shape: f32[32,32], index: 12, kind: output, shape index: {}]  }
   0x1   :  { %v46_v0 = vld [vmem:[%s750_s3] sm:$0xf]  ;;  %v43_v2 = vld [vmem:[%s751_s0 + $0x8] sm:$0xff]  ;;  %v44_v5 = vld [vmem:[%s751_s0 + $0x10] sm:$0xff]  ;;  %576 = vset.pattern.permute.xlu1 %v585_v45  ;;  %575 = vset.pattern.permute.xlu0 %v585_v45 }
   0x2   :  { %v42_v1 = vld [vmem:[%s751_s0] sm:$0xff]  ;;  %573 = vmatprep.subr.msk.bf16.mxu0 %vm63_vm0, %v46_v0  ;;  %v65_v3 = vsel %vm63_vm0, %v46_v0, 0  ;;  %v45_v6 = vld [vmem:[%s751_s0 + $0x18] sm:$0xff]  ;;  %v578_v9 = vld [vmem:[%s752_s5 + $0x8] sm:$0xff]  }
   0x3   :  { %v48_v4 = vpack.c.bf16 %v43_v2, %v42_v1  ;;  %532 = vmatpush3.bf16.msra.mxu0 %v65_v3  ;;  %v49_v7 = vpack.c.bf16 %v45_v6, %v44_v5  ;;  %v577_v8 = vld [vmem:[%s752_s5] sm:$0xff]   ;;  %v580_v26 = vld [vmem:[%s754_s7 + $0x8] sm:$0xff]   ;;  %v452_v46 = vld [vmem:[%s758_s2 + $0x10] sm:$0xff] }
   0x4   :  { %537 = vmatprep.subr.bf16.mxu0 %v577_v8  ;;  %v490_v10 = vld [vmem:[%s753_s4] ss:$0 sm:$0xff]  ;;  %v582_v43 = vld [vmem:[%s756_s10 + $0x8] sm:$0xff]   ;;  %v453_v48 = vld [vmem:[%s758_s2 + $0x18] sm:$0xff]  ;;  %vm456_vm3 = vcmp.gt.f32.partialorder %v452_v46, 0.5 }
   0x5   :  { %533 = vmatprep.mubr.msk.bf16.mxu0 %vm56_vm1, %v48_v4  ;;  %v579_v25 = vld [vmem:[%s754_s7] sm:$0xff]   ;;  %vm457_vm5 = vcmp.gt.f32.partialorder %v453_v48, 0.5  ;;  %v451_v49 = vld [vmem:[%s758_s2 + $0x8] sm:$0xff]  ;;  %v460_v50 = vsel %vm456_vm3, 1, %v585_v45  ;;  %v287_v5 = vld [vmem:[%s760_s1 + $0x10] sm:$0xff] }
   0x6   :  { %534 = vmatmul.mubr.msk.bf16.vlgmr.msra.gmra.mrb[0].mxu0 %vm56_vm1, %v49_v7  ;;  %v493_v27 = vld [vmem:[%s755_s6] ss:$0 sm:$0xff]  ;;  %vm455_vm6 = vcmp.gt.f32.partialorder %v451_v49, 0.5  ;;  %469 = vperm.xlu1 %576, %v460_v50   ;;  %v461_v52 = vsel %vm457_vm5, 1, %v585_v45  ;;  %v286_v62 = vld [vmem:[%s760_s1 + $0x8] sm:$0xff]  ;;  %v288_v6 = vld [vmem:[%s760_s1 + $0x18] sm:$0xff] }
   0x7   :  { %538 = vmatpush3.bf16.msra.mxu0 %v577_v8  ;;  %v581_v42 = vld [vmem:[%s756_s10] sm:$0xff]   ;;  %v459_v53 = vsel %vm455_vm6, 1, %v585_v45  ;;  %v584_v4 = vld [vmem:[%s757_s9 + $0x8] sm:$0xff]   ;;  %v294_v7 = vpack.c.bf16 %v288_v6, %v287_v5 }
   0x8   :  { %539 = vmatprep.subr.bf16.mxu0 %v578_v9  ;;  %553 = vmatprep.subr.bf16.mxu1 %v581_v42  ;;  %v583_v44 = vld [vmem:[%s757_s9] sm:$0xff]  }
   0x9   :  { %554 = vmatpush3.bf16.msra.mxu1 %v581_v42  ;;  %v450_v47 = vld [vmem:[%s758_s2] sm:$0xff] }
   0xa   :  { %555 = vmatprep.subr.bf16.mxu1 %v582_v43  ;;  %vm454_vm4 = vcmp.gt.f32.partialorder %v450_v47, 0.5  ;;  %472 = vperm.xlu1 %576, %v461_v52   ;;  %v498_v55 = vld [vmem:[%s759_s8] ss:$0 sm:$0xff] }
   0xb   :  { %540 = vmatpush3.bf16.msra.mxu0 %v578_v9  ;;  %v458_v51 = vsel %vm454_vm4, 1, %v585_v45  ;;  %v285_v61 = vld [vmem:[%s760_s1] sm:$0xff] }
   0xc   :  { %545 = vmatprep.subr.bf16.mxu0 %v579_v25  ;;  %463 = vperm.xlu0 %575, %v458_v51   ;;  %v293_v3 = vpack.c.bf16 %v286_v62, %v285_v61 }
   0xd   :  { %556 = vmatpush3.bf16.msra.mxu1 %v582_v43 }
   0xe   :  { %561 = vmatprep.subr.bf16.mxu1 %v583_v44 }
  0x10   :  { %466 = vperm.xlu0 %575, %v459_v53  }
  0x85   :  { %v470_v8 = vpop.permute.xlu1 %469 }
  0x86   :  { %vm476_vm7 = vcmp.eq.s32.totalorder %v470_v8, 1 }
  0x8b   :  { %v464_v9 = vpop.permute.xlu0 %463 }
  0x8c   :  { %vm474_vm8 = vcmp.eq.s32.totalorder %v464_v9, 1 }
  0xd9   :  { %v535_v11 = vpop.f32.mrb[0].mxu0 }
  0xda   :  { %v110_v12 = vadd.f32 %v535_v11, %v490_v10  ;;  %v101_v13 = vpop.f32.mrb[1].mxu0 }
  0xdb   :  { %v102_v14 = vadd.f32 %v490_v10, %v101_v13  ;;  %v536_v15 = vpop.f32.mrb[2].mxu0 }
  0xdc   :  { %v113_v16 = vadd.f32 %v536_v15, %v490_v10  ;;  %v104_v17 = vpop.f32.mrb[3].mxu0  ;;  %v118_v19 = vmax.f32 %v110_v12, 0.0 }
  0xdd   :  { %v105_v18 = vadd.f32 %v490_v10, %v104_v17  ;;  %v116_v21 = vmax.f32 %v102_v14, 0.0  ;;  %v511_v10 = vld [vmem:[%s761_s11] ss:$0 sm:$0xff]  ;;  %v473_v17 = vpop.permute.xlu1 %472 }
  0xde   :  { %v119_v20 = vmax.f32 %v113_v16, 0.0  ;;  %vm477_vm9 = vcmp.eq.s32.totalorder %v473_v17, 1 }
  0xdf   :  { %v117_v22 = vmax.f32 %v105_v18, 0.0 }
  0xe0   :  { %v126_v23 = vpack.c.bf16 %v119_v20, %v118_v19 }
  0xe1   :  { %v125_v24 = vpack.c.bf16 %v117_v22, %v116_v21  ;;  %v467_v21 = vpop.permute.xlu0 %466 }
  0xe2   :  { %vm475_vm10 = vcmp.eq.s32.totalorder %v467_v21, 1 }
  0xe3   :  { %541 = vmatprep.mubr.msk.bf16.mxu0 %vm145_vm2, %v125_v24 }
  0xe4   :  { %542 = vmatmul.mubr.msk.bf16.vlgmr.msra.gmra.mrb[4].mxu0 %vm145_vm2, %v126_v23 }
  0xe5   :  { %546 = vmatpush3.bf16.msra.mxu0 %v579_v25 }
  0xe6   :  { %547 = vmatprep.subr.bf16.mxu0 %v580_v26 }
  0xe9   :  { %548 = vmatpush3.bf16.msra.mxu0 %v580_v26 }
 0x1b7   :  { %v543_v28 = vpop.f32.mrb[4].mxu0 }
 0x1b8   :  { %v195_v29 = vadd.f32 %v543_v28, %v493_v27  ;;  %v186_v30 = vpop.f32.mrb[5].mxu0 }
 0x1b9   :  { %v187_v31 = vadd.f32 %v493_v27, %v186_v30  ;;  %v544_v32 = vpop.f32.mrb[6].mxu0 }
 0x1ba   :  { %v198_v33 = vadd.f32 %v544_v32, %v493_v27  ;;  %v189_v34 = vpop.f32.mrb[7].mxu0  ;;  %v203_v36 = vmax.f32 %v195_v29, 0.0 }
 0x1bb   :  { %v190_v35 = vadd.f32 %v493_v27, %v189_v34  ;;  %v201_v38 = vmax.f32 %v187_v31, 0.0 }
 0x1bc   :  { %v204_v37 = vmax.f32 %v198_v33, 0.0 }
 0x1bd   :  { %v202_v39 = vmax.f32 %v190_v35, 0.0 }
 0x1be   :  { %v211_v40 = vpack.c.bf16 %v204_v37, %v203_v36 }
 0x1bf   :  { %v210_v41 = vpack.c.bf16 %v202_v39, %v201_v38 }
 0x1c1   :  { %549 = vmatprep.mubr.msk.bf16.mxu0 %vm145_vm2, %v210_v41 }
 0x1c2   :  { %550 = vmatmul.mubr.msk.bf16.vlgmr.msra.gmra.mrb[8].mxu0 %vm145_vm2, %v211_v40 }
 0x295   :  { %v551_v54 = vpop.f32.mrb[8].mxu0 }
 0x296   :  { %v270_v56 = vpop.f32.mrb[9].mxu0  ;;  %v279_v58 = vadd.f32 %v551_v54, %v498_v55 }
 0x297   :  { %v552_v57 = vpop.f32.mrb[10].mxu0  ;;  %v271_v63 = vadd.f32 %v498_v55, %v270_v56 }
 0x298   :  { %v282_v59 = vadd.f32 %v552_v57, %v498_v55  ;;  %v273_v60 = vpop.f32.mrb[11].mxu0 }
 0x299   :  { %v274_v0 = vadd.f32 %v498_v55, %v273_v60 }
 0x29a   :  { %v300_v1 = vpack.c.bf16 %v282_v59, %v279_v58 }
 0x29b   :  { %v299_v2 = vpack.c.bf16 %v274_v0, %v271_v63 }
 0x29d   :  { %557 = vmatprep.mubr.msk.bf16.mxu1 %vm145_vm2, %v299_v2 }
 0x29e   :  { %558 = vmatmul.mubr.msk.bf16.vlgmr.msra.gmra.mrb[0].mxu1 %vm145_vm2, %v300_v1 }
 0x29f   :  { %562 = vmatpush3.bf16.msra.mxu1 %v583_v44  ;;  %565 = vmatprep.mubr.msk.bf16.mxu1 %vm145_vm2, %v293_v3 }
 0x2a0   :  { %563 = vmatprep.subr.bf16.mxu1 %v584_v4 }
 0x2a3   :  { %564 = vmatpush3.bf16.msra.mxu1 %v584_v4 }
 0x2aa   :  { %566 = vmatmul.mubr.msk.bf16.vlgmr.msra.gmra.mrb[0].mxu1 %vm145_vm2, %v294_v7 }
 0x37d   :  { %v567_v11 = vpop.f32.mrb[0].mxu1 }
 0x37e   :  { %v444_v12 = vadd.f32 %v567_v11, %v511_v10  ;;  %v420_v13 = vpop.f32.mrb[1].mxu1 }
 0x37f   :  { %v442_v14 = vadd.f32 %v511_v10, %v420_v13  ;;  %v568_v15 = vpop.f32.mrb[2].mxu1 }
 0x380   :  { %v448_v16 = vmul.f32 5.656854, %v444_v12  ;;  %v445_v18 = vadd.f32 %v568_v15, %v511_v10  ;;  %v423_v19 = vpop.f32.mrb[3].mxu1 }
 0x381   :  { %v446_v20 = vmul.f32 5.656854, %v442_v14  ;;  %v443_v22 = vadd.f32 %v511_v10, %v423_v19 }
 0x382   :  { %v480_v23 = vsel %vm476_vm7, 0.0, %v448_v16  ;;  %v449_v24 = vmul.f32 5.656854, %v445_v18 }
 0x383   :  { %484 = vst.msk [vmem:[%s762_s12 + $0x10] sm:$0xff] %vm145_vm2, %v480_v23  ;;  %v478_v25 = vsel %vm474_vm8, 0.0, %v446_v20  ;;  %v447_v26 = vmul.f32 5.656854, %v443_v22 }
 0x384   :  { %482 = vst.msk [vmem:[%s762_s12] sm:$0xff] %vm145_vm2, %v478_v25  ;;  %v481_v27 = vsel %vm477_vm9, 0.0, %v449_v24 }
 0x385   :  { %485 = vst.msk [vmem:[%s762_s12 + $0x18] sm:$0xff] %vm145_vm2, %v481_v27  ;;  %v479_v28 = vsel %vm475_vm10, 0.0, %v447_v26 }
 0x386   :  { %483 = vst.msk [vmem:[%s762_s12 + $0x8] sm:$0xff] %vm145_vm2, %v479_v28 }

// kernel: hybrid_attention_decoder_forward.9
= control target key start
LH: loop header
LB: loop body
LE: loop exit
PB: predicated region body
PF: predicated region fallthrough
CT: control target
= control target key end

     0   :  { %vm38_vm0 = vcmask 261120   ;;  %vm313_vm1 = vcmask 519168   ;;  %vm208_vm2 = vcmask 781312   ;;  %s534_s0 = inlined_call_operand.vmem [shape: f32[32,32], index: 0, kind: input, shape index: {}]   ;;  %s535_s6 = inlined_call_operand.vmem [shape: bf16[32,64], index: 6, kind: input, shape index: {}]   ;;  %s536_s4 = inlined_call_operand.vmem [shape: bf16[32,96], index: 4, kind: input, shape index: {}]   ;;  %s537_s1 = inlined_call_operand.vmem [shape: f32[32,32], index: 1, kind: input, shape index: {}]   ;;  %s538_s2 = inlined_call_operand.vmem [shape: f32[1,32], index: 2, kind: input, shape index: {}]   ;;  %s539_s3 = inlined_call_operand.vmem [shape: f32[1,32], index: 3, kind: input, shape index: {}]   ;;  %s540_s7 = inlined_call_operand.vmem [shape: f32[1,64], index: 7, kind: input, shape index: {}]   ;;  %s541_s9 = inlined_call_operand.vmem [shape: bf16[32,64], index: 9, kind: output, shape index: {1}]   ;;  %s542_s5 = inlined_call_operand.vmem [shape: f32[1,96], index: 5, kind: input, shape index: {}]   ;;  %s543_s8 = inlined_call_operand.vmem [shape: bf16[32,96], index: 8, kind: output, shape index: {0}]  }
   0x1   :  { %v32_v0 = vld [vmem:[%s534_s0] sm:$0xff]  ;;  %v34_v1 = vld [vmem:[%s534_s0 + $0x10] sm:$0xff]  ;;  %v33_v2 = vld [vmem:[%s534_s0 + $0x8] sm:$0xff] }
   0x2   :  { %v39_v3 = vsel %vm38_vm0, %v32_v0, 0.0  ;;  %v45_v4 = vsel %vm38_vm0, %v34_v1, 0.0  ;;  %v35_v5 = vld [vmem:[%s534_s0 + $0x18] sm:$0xff]  ;;  %v42_v6 = vsel %vm38_vm0, %v33_v2, 0.0  ;;  %v378_v28 = vld [vmem:[%s535_s6] sm:$0xff]   ;;  %v380_v30 = vld [vmem:[%s535_s6 + $0x8] sm:$0xff]  }
   0x3   :  { %40 = vadd.xlane.f32.xlu0 %v39_v3  ;;  %46 = vadd.xlane.f32.xlu1 %v45_v4  ;;  %v48_v7 = vsel %vm38_vm0, %v35_v5, 0.0  ;;  %v379_v29 = vld [vmem:[%s536_s4] sm:$0xff]   ;;  %v381_v31 = vld [vmem:[%s536_s4 + $0x8] sm:$0xff]   ;;  %v215_v35 = vld [vmem:[%s537_s1 + $0x10] sm:$0xff] }
   0x4   :  { %370 = vmatprep.subr.bf16.mxu1 %v378_v28  ;;  %362 = vmatprep.subr.bf16.mxu0 %v379_v29  ;;  %v213_v32 = vld [vmem:[%s537_s1] sm:$0xff]  ;;  %v214_v33 = vld [vmem:[%s537_s1 + $0x8] sm:$0xff]  ;;  %v216_v36 = vld [vmem:[%s537_s1 + $0x18] sm:$0xff] }
   0x5   :  { %371 = vmatpush3.bf16.msra.mxu1 %v378_v28  ;;  %363 = vmatpush3.bf16.msra.mxu0 %v379_v29  ;;  %v222_v34 = vpack.c.bf16 %v214_v33, %v213_v32  ;;  %v223_v37 = vpack.c.bf16 %v216_v36, %v215_v35  ;;  %v326_v52 = vld [vmem:[%s538_s2] ss:$0 sm:$0xff] }
   0x6   :  { %372 = vmatprep.subr.bf16.mxu1 %v380_v30  ;;  %364 = vmatprep.subr.bf16.mxu0 %v381_v31  ;;  %v327_v58 = vld [vmem:[%s539_s3] ss:$0 sm:$0xff] }
   0x7   :  { %43 = vadd.xlane.f32.xlu0 %v42_v6  ;;  %49 = vadd.xlane.f32.xlu1 %v48_v7  ;;  %v337_v6 = vld [vmem:[%s540_s7] ss:$0 sm:$0xff] }
   0x8   :  { %374 = vmatprep.mubr.msk.bf16.mxu1 %vm38_vm0, %v222_v34 }
   0x9   :  { %373 = vmatpush3.bf16.msra.mxu1 %v380_v30  ;;  %365 = vmatpush3.bf16.msra.mxu0 %v381_v31 }
   0xc   :  { %375 = vmatmul.mubr.msk.bf16.vlgmr.msra.gmra.mrb[0].mxu1 %vm38_vm0, %v223_v37 }
  0x90   :  { %v41_v8 = vpop.xlane.xlu0 %40  ;;  %v47_v9 = vpop.xlane.xlu1 %46 }
  0x91   :  { %v52_v10 = vmul.f32 0.03125, %v41_v8  ;;  %v54_v11 = vmul.f32 0.03125, %v47_v9 }
  0x93   :  { %v56_v12 = vsub.f32 %v32_v0, %v52_v10  ;;  %v456_v13 = vsub.f32 %v34_v1, %v54_v11 }
  0x94   :  { %v44_v14 = vpop.xlane.xlu0 %43  ;;  %v50_v15 = vpop.xlane.xlu1 %49 }
  0x95   :  { %v53_v16 = vmul.f32 0.03125, %v44_v14  ;;  %v55_v17 = vmul.f32 0.03125, %v50_v15  ;;  %v60_v18 = vmul.f32 %v56_v12, %v56_v12  ;;  %v62_v19 = vmul.f32 %v456_v13, %v456_v13 }
  0x97   :  { %v57_v20 = vsub.f32 %v33_v2, %v53_v16  ;;  %v460_v21 = vsub.f32 %v35_v5, %v55_v17  ;;  %v64_v22 = vsel %vm38_vm0, %v60_v18, 0.0  ;;  %v70_v23 = vsel %vm38_vm0, %v62_v19, 0.0  ;;  %v328_v19 = vld [vmem:[%s542_s5] ss:$0 sm:$0xff] }
  0x98   :  { %65 = vadd.xlane.f32.xlu0 %v64_v22 }
  0x99   :  { %v61_v24 = vmul.f32 %v57_v20, %v57_v20  ;;  %v63_v25 = vmul.f32 %v460_v21, %v460_v21 }
  0x9b   :  { %v67_v26 = vsel %vm38_vm0, %v61_v24, 0.0  ;;  %v73_v27 = vsel %vm38_vm0, %v63_v25, 0.0 }
  0x9c   :  { %71 = vadd.xlane.f32.xlu0 %v70_v23  ;;  %68 = vadd.xlane.f32.xlu1 %v67_v26 }
  0xa0   :  { %74 = vadd.xlane.f32.xlu1 %v73_v27 }
  0xdf   :  { %v376_v7 = vpop.f32.mrb[0].mxu1 }
  0xe0   :  { %v291_v8 = vadd.f32 %v376_v7, %v337_v6  ;;  %v282_v9 = vpop.f32.mrb[1].mxu1 }
  0xe1   :  { %v283_v10 = vadd.f32 %v337_v6, %v282_v9  ;;  %v377_v11 = vpop.f32.mrb[2].mxu1 }
  0xe2   :  { %v285_v14 = vpop.f32.mrb[3].mxu1 }
  0xe3   :  { %v350_v15 = vpack.c.bf16 %v283_v10, %v283_v10  ;;  %v286_v16 = vadd.f32 %v337_v6, %v285_v14 }
  0xe5   :  { %314 = vst.msk [vmem:[%s541_s9] sm:$0xf] %vm313_vm1, %v350_v15  ;;  %v351_v18 = vpack.c.bf16 %v286_v16, %v286_v16 }
  0xe7   :  { %315 = vst.msk [vmem:[%s541_s9 + $0x4] sm:$0xf] %vm313_vm1, %v351_v18 }
 0x125   :  { %v66_v38 = vpop.xlane.xlu0 %65 }
 0x126   :  { %v76_v39 = vmul.f32 0.03125, %v66_v38 }
 0x128   :  { %v80_v40 = vadd.f32 1e-06, %v76_v39 }
 0x129   :  { %v69_v41 = vpop.xlane.xlu1 %68  ;;  %v72_v42 = vpop.xlane.xlu0 %71 }
 0x12a   :  { %382 = vrsqrt.f32 %v80_v40  ;;  %v77_v43 = vmul.f32 0.03125, %v69_v41  ;;  %v78_v44 = vmul.f32 0.03125, %v72_v42 }
 0x12c   :  { %v81_v45 = vadd.f32 1e-06, %v77_v43  ;;  %v82_v46 = vadd.f32 1e-06, %v78_v44 }
 0x12d   :  { %v75_v47 = vpop.xlane.xlu1 %74 }
 0x12e   :  { %384 = vrsqrt.f32 %v81_v45  ;;  %v79_v48 = vmul.f32 0.03125, %v75_v47 }
 0x12f   :  { %386 = vrsqrt.f32 %v82_v46 }
 0x130   :  { %v83_v49 = vadd.f32 1e-06, %v79_v48 }
 0x132   :  { %388 = vrsqrt.f32 %v83_v49 }
 0x134   :  { %v383_v50 = vpop.eup %382 }
 0x135   :  { %v88_v51 = vmul.f32 %v383_v50, %v56_v12  ;;  %v352_v12 = vpack.c.bf16 %v291_v8, %v291_v8 }
 0x137   :  { %v98_v56 = vmul.f32 %v326_v52, %v88_v51  ;;  %316 = vst.msk [vmem:[%s541_s9 + $0x8] sm:$0xf] %vm313_vm1, %v352_v12 }
 0x138   :  { %v385_v53 = vpop.eup %384 }
 0x139   :  { %v387_v54 = vpop.eup %386  ;;  %v89_v55 = vmul.f32 %v385_v53, %v57_v20  ;;  %v108_v62 = vadd.f32 %v327_v58, %v98_v56 }
 0x13a   :  { %v90_v57 = vmul.f32 %v387_v54, %v456_v13  ;;  %v294_v13 = vadd.f32 %v377_v11, %v337_v6 }
 0x13b   :  { %v99_v59 = vmul.f32 %v326_v52, %v89_v55 }
 0x13c   :  { %v389_v60 = vpop.eup %388  ;;  %v100_v0 = vmul.f32 %v326_v52, %v90_v57  ;;  %v353_v17 = vpack.c.bf16 %v294_v13, %v294_v13 }
 0x13d   :  { %v91_v61 = vmul.f32 %v389_v60, %v460_v21  ;;  %v109_v63 = vadd.f32 %v327_v58, %v99_v59 }
 0x13e   :  { %v110_v3 = vadd.f32 %v327_v58, %v100_v0  ;;  %317 = vst.msk [vmem:[%s541_s9 + $0xc] sm:$0xf] %vm313_vm1, %v353_v17 }
 0x13f   :  { %v117_v1 = vpack.c.bf16 %v109_v63, %v108_v62  ;;  %v101_v2 = vmul.f32 %v326_v52, %v91_v61 }
 0x141   :  { %366 = vmatprep.mubr.msk.bf16.mxu0 %vm38_vm0, %v117_v1  ;;  %v111_v4 = vadd.f32 %v327_v58, %v101_v2 }
 0x143   :  { %v118_v5 = vpack.c.bf16 %v111_v4, %v110_v3 }
 0x145   :  { %367 = vmatmul.mubr.msk.bf16.vlgmr.msra.gmra.mrb[0].mxu0 %vm38_vm0, %v118_v5 }
 0x218   :  { %v368_v20 = vpop.f32.mrb[0].mxu0 }
 0x219   :  { %v186_v21 = vadd.f32 %v368_v20, %v328_v19  ;;  %v177_v22 = vpop.f32.mrb[1].mxu0 }
 0x21a   :  { %v178_v23 = vadd.f32 %v328_v19, %v177_v22  ;;  %v369_v24 = vpop.f32.mrb[2].mxu0 }
 0x21b   :  { %v348_v25 = vpack.c.bf16 %v186_v21, %v186_v21  ;;  %v189_v26 = vadd.f32 %v369_v24, %v328_v19  ;;  %v180_v27 = vpop.f32.mrb[3].mxu0 }
 0x21c   :  { %v346_v28 = vpack.c.bf16 %v178_v23, %v178_v23  ;;  %v181_v29 = vadd.f32 %v328_v19, %v180_v27 }
 0x21d   :  { %211 = vst.msk [vmem:[%s543_s8 + $0x8] sm:$0xf] %vm208_vm2, %v348_v25  ;;  %v349_v30 = vpack.c.bf16 %v189_v26, %v189_v26 }
 0x21e   :  { %209 = vst.msk [vmem:[%s543_s8] sm:$0xf] %vm208_vm2, %v346_v28  ;;  %v347_v31 = vpack.c.bf16 %v181_v29, %v181_v29 }
 0x21f   :  { %212 = vst.msk [vmem:[%s543_s8 + $0xc] sm:$0xf] %vm208_vm2, %v349_v30 }
 0x220   :  { %210 = vst.msk [vmem:[%s543_s8 + $0x4] sm:$0xf] %vm208_vm2, %v347_v31 }

// kernel: hybrid_attention_decoder_forward.11
= control target key start
LH: loop header
LB: loop body
LE: loop exit
PB: predicated region body
PF: predicated region fallthrough
CT: control target
= control target key end

     0   :  { %vm36_vm0 = vcmask 261120   ;;  %vm235_vm5 = vcmask 523264   ;;  %s542_s0 = inlined_call_operand.vmem [shape: f32[32,32], index: 0, kind: input, shape index: {}]   ;;  %s543_s4 = inlined_call_operand.vmem [shape: bf16[32,64], index: 4, kind: input, shape index: {}]   ;;  %s544_s6 = inlined_call_operand.vmem [shape: bf16[64,32], index: 6, kind: input, shape index: {}]   ;;  %s545_s2 = inlined_call_operand.vmem [shape: f32[1,32], index: 2, kind: input, shape index: {}]   ;;  %s546_s3 = inlined_call_operand.vmem [shape: f32[1,32], index: 3, kind: input, shape index: {}]   ;;  %s547_s1 = inlined_call_operand.vmem [shape: f32[32,1], index: 1, kind: input, shape index: {}]   ;;  %s548_s5 = inlined_call_operand.vmem [shape: f32[1,64], index: 5, kind: input, shape index: {}]   ;;  %s549_s7 = inlined_call_operand.vmem [shape: f32[1,32], index: 7, kind: input, shape index: {}]   ;;  %s550_s8 = inlined_call_operand.vmem [shape: f32[32,32], index: 8, kind: output, shape index: {}]  }
   0x1   :  { %v445_v0 = vld [vmem:[%s542_s0] sm:$0xff]  ;;  %v450_v1 = vld [vmem:[%s542_s0 + $0x10] sm:$0xff]  ;;  %v455_v2 = vld [vmem:[%s542_s0 + $0x8] sm:$0xff] }
   0x2   :  { %v37_v3 = vsel %vm36_vm0, %v445_v0, 0.0  ;;  %v43_v4 = vsel %vm36_vm0, %v450_v1, 0.0  ;;  %v464_v5 = vld [vmem:[%s542_s0 + $0x18] sm:$0xff]  ;;  %v40_v6 = vsel %vm36_vm0, %v455_v2, 0.0  ;;  %v382_v28 = vld [vmem:[%s543_s4] sm:$0xff]   ;;  %v383_v29 = vld [vmem:[%s543_s4 + $0x8] sm:$0xff]  }
   0x3   :  { %38 = vadd.xlane.f32.xlu0 %v37_v3  ;;  %44 = vadd.xlane.f32.xlu1 %v43_v4  ;;  %v46_v7 = vsel %vm36_vm0, %v464_v5, 0.0  ;;  %v384_v30 = vld [vmem:[%s544_s6] sm:$0xff]   ;;  %v385_v31 = vld [vmem:[%s544_s6 + $0x8] sm:$0xff]   ;;  %v386_v3 = vld [vmem:[%s544_s6 + $0x10] sm:$0xff]  }
   0x4   :  { %359 = vmatprep.subr.bf16.mxu0 %v382_v28  ;;  %367 = vmatprep.subr.bf16.mxu1 %v384_v30  ;;  %v335_v46 = vld [vmem:[%s545_s2] ss:$0 sm:$0xff]  ;;  %v387_v4 = vld [vmem:[%s544_s6 + $0x18] sm:$0xff]  }
   0x5   :  { %360 = vmatpush3.bf16.msra.mxu0 %v382_v28  ;;  %368 = vmatpush3.bf16.msra.mxu1 %v384_v30  ;;  %v336_v52 = vld [vmem:[%s546_s3] ss:$0 sm:$0xff] }
   0x6   :  { %361 = vmatprep.subr.bf16.mxu0 %v383_v29  ;;  %369 = vmatprep.subr.bf16.mxu1 %v385_v31 }
   0x7   :  { %41 = vadd.xlane.f32.xlu0 %v40_v6  ;;  %47 = vadd.xlane.f32.xlu1 %v46_v7  ;;  %v396_v6 = vmov 0   ;;  %v296_v7 = vld [vmem:[%s547_s1 + $0x8] sm:$0xff] }
   0x8   :  { %381 = vset.pattern.permute.xlu1 %v396_v6  ;;  %380 = vset.pattern.permute.xlu0 %v396_v6  ;;  %vm300_vm1 = vcmp.gt.f32.partialorder %v296_v7, 0.5 }
   0x9   :  { %362 = vmatpush3.bf16.msra.mxu0 %v383_v29  ;;  %370 = vmatpush3.bf16.msra.mxu1 %v385_v31 }
   0xa   :  { %371 = vmatprep.subr.bf16.mxu1 %v386_v3 }
   0xd   :  { %372 = vmatpush3.bf16.msra.mxu1 %v386_v3 }
   0xe   :  { %373 = vmatprep.subr.bf16.mxu1 %v387_v4 }
  0x11   :  { %374 = vmatpush3.bf16.msra.mxu1 %v387_v4 }
  0x90   :  { %v39_v8 = vpop.xlane.xlu0 %38  ;;  %v45_v9 = vpop.xlane.xlu1 %44 }
  0x91   :  { %v50_v10 = vmul.f32 0.03125, %v39_v8  ;;  %v52_v11 = vmul.f32 0.03125, %v45_v9  ;;  %v297_v8 = vld [vmem:[%s547_s1 + $0x10] sm:$0xff]  ;;  %v295_v9 = vld [vmem:[%s547_s1] sm:$0xff] }
  0x92   :  { %vm301_vm2 = vcmp.gt.f32.partialorder %v297_v8, 0.5  ;;  %vm299_vm3 = vcmp.gt.f32.partialorder %v295_v9, 0.5 }
  0x93   :  { %v54_v12 = vsub.f32 %v445_v0, %v50_v10  ;;  %v56_v13 = vsub.f32 %v450_v1, %v52_v11  ;;  %v304_v10 = vsel %vm300_vm1, 1, %v396_v6  ;;  %v298_v11 = vld [vmem:[%s547_s1 + $0x18] sm:$0xff] }
  0x94   :  { %v42_v14 = vpop.xlane.xlu0 %41  ;;  %v48_v15 = vpop.xlane.xlu1 %47  ;;  %vm302_vm4 = vcmp.gt.f32.partialorder %v298_v11, 0.5 }
  0x95   :  { %v51_v16 = vmul.f32 0.03125, %v42_v14  ;;  %v53_v17 = vmul.f32 0.03125, %v48_v15  ;;  %v58_v18 = vmul.f32 %v54_v12, %v54_v12  ;;  %v60_v19 = vmul.f32 %v56_v13, %v56_v13  ;;  %v337_v15 = vld [vmem:[%s548_s5] ss:$0 sm:$0xff] }
  0x96   :  { %v306_v14 = vsel %vm302_vm4, 1, %v396_v6 }
  0x97   :  { %v55_v20 = vsub.f32 %v455_v2, %v51_v16  ;;  %v57_v21 = vsub.f32 %v464_v5, %v53_v17  ;;  %v62_v22 = vsel %vm36_vm0, %v58_v18, 0.0  ;;  %v68_v23 = vsel %vm36_vm0, %v60_v19, 0.0 }
  0x98   :  { %63 = vadd.xlane.f32.xlu0 %v62_v22 }
  0x99   :  { %v59_v24 = vmul.f32 %v55_v20, %v55_v20  ;;  %v61_v25 = vmul.f32 %v57_v21, %v57_v21 }
  0x9b   :  { %v65_v26 = vsel %vm36_vm0, %v59_v24, 0.0  ;;  %v71_v27 = vsel %vm36_vm0, %v61_v25, 0.0 }
  0x9c   :  { %69 = vadd.xlane.f32.xlu0 %v68_v23  ;;  %66 = vadd.xlane.f32.xlu1 %v65_v26 }
  0xa0   :  { %72 = vadd.xlane.f32.xlu1 %v71_v27 }
  0xb1   :  { %311 = vperm.xlu1 %381, %v304_v10  }
 0x125   :  { %v64_v32 = vpop.xlane.xlu0 %63 }
 0x126   :  { %v74_v33 = vmul.f32 0.03125, %v64_v32  ;;  %v342_v32 = vld [vmem:[%s549_s7] ss:$0 sm:$0xff] }
 0x128   :  { %v78_v34 = vadd.f32 1e-06, %v74_v33 }
 0x129   :  { %v67_v35 = vpop.xlane.xlu1 %66  ;;  %v70_v36 = vpop.xlane.xlu0 %69 }
 0x12a   :  { %388 = vrsqrt.f32 %v78_v34  ;;  %v75_v37 = vmul.f32 0.03125, %v67_v35  ;;  %v76_v38 = vmul.f32 0.03125, %v70_v36 }
 0x12c   :  { %v79_v39 = vadd.f32 1e-06, %v75_v37  ;;  %v80_v40 = vadd.f32 1e-06, %v76_v38 }
 0x12d   :  { %v73_v41 = vpop.xlane.xlu1 %72 }
 0x12e   :  { %390 = vrsqrt.f32 %v79_v39  ;;  %v77_v42 = vmul.f32 0.03125, %v73_v41 }
 0x12f   :  { %392 = vrsqrt.f32 %v80_v40 }
 0x130   :  { %v81_v43 = vadd.f32 1e-06, %v77_v42 }
 0x131   :  { %v312_v30 = vpop.permute.xlu1 %311 }
 0x132   :  { %394 = vrsqrt.f32 %v81_v43  ;;  %vm320_vm9 = vcmp.eq.s32.totalorder %v312_v30, 1 }
 0x134   :  { %v389_v44 = vpop.eup %388 }
 0x135   :  { %v86_v45 = vmul.f32 %v389_v44, %v54_v12  ;;  %v303_v12 = vsel %vm299_vm3, 1, %v396_v6 }
 0x136   :  { %308 = vperm.xlu0 %380, %v303_v12  }
 0x137   :  { %v96_v50 = vmul.f32 %v335_v46, %v86_v45 }
 0x138   :  { %v391_v47 = vpop.eup %390 }
 0x139   :  { %v393_v48 = vpop.eup %392  ;;  %v87_v49 = vmul.f32 %v391_v47, %v55_v20  ;;  %v106_v56 = vadd.f32 %v336_v52, %v96_v50 }
 0x13a   :  { %v88_v51 = vmul.f32 %v393_v48, %v56_v13  ;;  %v305_v13 = vsel %vm301_vm2, 1, %v396_v6 }
 0x13b   :  { %v97_v53 = vmul.f32 %v335_v46, %v87_v49  ;;  %314 = vperm.xlu1 %381, %v305_v13  }
 0x13c   :  { %v395_v54 = vpop.eup %394  ;;  %v98_v58 = vmul.f32 %v335_v46, %v88_v51 }
 0x13d   :  { %v89_v55 = vmul.f32 %v395_v54, %v57_v21  ;;  %v107_v57 = vadd.f32 %v336_v52, %v97_v53 }
 0x13e   :  { %v108_v61 = vadd.f32 %v336_v52, %v98_v58 }
 0x13f   :  { %v115_v59 = vpack.c.bf16 %v107_v57, %v106_v56  ;;  %v99_v60 = vmul.f32 %v335_v46, %v89_v55  ;;  %317 = vperm.xlu1 %381, %v306_v14  }
 0x141   :  { %363 = vmatprep.mubr.msk.bf16.mxu0 %vm36_vm0, %v115_v59  ;;  %v109_v62 = vadd.f32 %v336_v52, %v99_v60 }
 0x143   :  { %v116_v63 = vpack.c.bf16 %v109_v62, %v108_v61 }
 0x145   :  { %364 = vmatmul.mubr.msk.bf16.vlgmr.msra.gmra.mrb[0].mxu0 %vm36_vm0, %v116_v63 }
 0x1b5   :  { %v309_v34 = vpop.permute.xlu0 %308 }
 0x1b6   :  { %vm319_vm6 = vcmp.eq.s32.totalorder %v309_v34, 1 }
 0x1ba   :  { %v315_v31 = vpop.permute.xlu1 %314 }
 0x1bb   :  { %vm321_vm7 = vcmp.eq.s32.totalorder %v315_v31, 1 }
 0x1be   :  { %v318_v39 = vpop.permute.xlu1 %317 }
 0x1bf   :  { %vm322_vm8 = vcmp.eq.s32.totalorder %v318_v39, 1 }
 0x218   :  { %v365_v16 = vpop.f32.mrb[0].mxu0 }
 0x219   :  { %v184_v17 = vadd.f32 %v365_v16, %v337_v15  ;;  %v175_v18 = vpop.f32.mrb[1].mxu0 }
 0x21a   :  { %v176_v19 = vadd.f32 %v337_v15, %v175_v18  ;;  %v366_v20 = vpop.f32.mrb[2].mxu0 }
 0x21b   :  { %v187_v21 = vadd.f32 %v366_v20, %v337_v15  ;;  %v178_v22 = vpop.f32.mrb[3].mxu0  ;;  %v192_v24 = vmax.f32 %v184_v17, 0.0 }
 0x21c   :  { %v179_v23 = vadd.f32 %v337_v15, %v178_v22  ;;  %v190_v26 = vmax.f32 %v176_v19, 0.0 }
 0x21d   :  { %v193_v25 = vmax.f32 %v187_v21, 0.0 }
 0x21e   :  { %v191_v27 = vmax.f32 %v179_v23, 0.0 }
 0x21f   :  { %v204_v28 = vpack.c.bf16 %v193_v25, %v192_v24 }
 0x220   :  { %v203_v29 = vpack.c.bf16 %v191_v27, %v190_v26 }
 0x222   :  { %375 = vmatprep.mubr.msk.bf16.mxu1 %vm235_vm5, %v203_v29 }
 0x223   :  { %376 = vmatmul.mubr.msk.bf16.vlgmr.msra.gmra.mrb[0].mxu1 %vm235_vm5, %v204_v28 }
 0x2f6   :  { %v377_v33 = vpop.f32.mrb[0].mxu1 }
 0x2f7   :  { %v285_v35 = vadd.f32 %v377_v33, %v342_v32  ;;  %v276_v36 = vpop.f32.mrb[1].mxu1 }
 0x2f8   :  { %v277_v37 = vadd.f32 %v342_v32, %v276_v36  ;;  %v378_v38 = vpop.f32.mrb[2].mxu1 }
 0x2f9   :  { %v293_v40 = vadd.f32 %v285_v35, %v450_v1  ;;  %v288_v41 = vadd.f32 %v378_v38, %v342_v32  ;;  %v279_v42 = vpop.f32.mrb[3].mxu1 }
 0x2fa   :  { %v291_v43 = vadd.f32 %v277_v37, %v445_v0  ;;  %v280_v44 = vadd.f32 %v342_v32, %v279_v42 }
 0x2fb   :  { %v325_v45 = vsel %vm321_vm7, 0.0, %v293_v40  ;;  %v294_v46 = vadd.f32 %v288_v41, %v464_v5 }
 0x2fc   :  { %329 = vst.msk [vmem:[%s550_s8 + $0x10] sm:$0xff] %vm36_vm0, %v325_v45  ;;  %v292_v47 = vadd.f32 %v280_v44, %v455_v2  ;;  %v323_v48 = vsel %vm319_vm6, 0.0, %v291_v43 }
 0x2fd   :  { %v326_v1 = vsel %vm322_vm8, 0.0, %v294_v46  ;;  %327 = vst.msk [vmem:[%s550_s8] sm:$0xff] %vm36_vm0, %v323_v48 }
 0x2fe   :  { %330 = vst.msk [vmem:[%s550_s8 + $0x18] sm:$0xff] %vm36_vm0, %v326_v1  ;;  %v324_v0 = vsel %vm320_vm9, 0.0, %v292_v47 }
 0x2ff   :  { %328 = vst.msk [vmem:[%s550_s8 + $0x8] sm:$0xff] %vm36_vm0, %v324_v0 }

// kernel: hybrid_attention_decoder_forward.10
= control target key start
LH: loop header
LB: loop body
LE: loop exit
PB: predicated region body
PF: predicated region fallthrough
CT: control target
= control target key end

     0   :  { %s2256_s0 = inlined_call_operand.vmem [shape: s32[2], index: 0, kind: input, shape index: {}]   ;;  %s2257_s1 = inlined_call_operand.vmem [shape: bf16[2,16,96], index: 1, kind: input, shape index: {}]   ;;  %s2258_s2 = inlined_call_operand.vmem [shape: bf16[2,16,64], index: 2, kind: input, shape index: {}]   ;;  %s2259_s3 = inlined_call_operand.vmem [shape: f32[2,16,32], index: 3, kind: input, shape index: {}]   ;;  %s2260_s4 = inlined_call_operand.vmem [shape: f32[2,1,16], index: 4, kind: input, shape index: {}]   ;;  %s2261_s5 = inlined_call_operand.vmem [shape: f32[2,16,1], index: 5, kind: input, shape index: {}]   ;;  %s2262_s6 = inlined_call_operand.vmem [shape: bf16[32,32], index: 6, kind: input, shape index: {}]   ;;  %s2263_s7 = inlined_call_operand.vmem [shape: f32[1,32], index: 7, kind: input, shape index: {}]   ;;  %s2264_s8 = inlined_call_operand.vmem [shape: bf16[32,32], index: 8, kind: input, shape index: {}]   ;;  %s2265_s9 = inlined_call_operand.vmem [shape: f32[1,32], index: 9, kind: input, shape index: {}]   ;;  %s2266_s10 = inlined_call_operand.vmem [shape: f32[2,16,32], index: 10, kind: output, shape index: {0}]   ;;  %s2267_s11 = inlined_call_operand.hbm [shape: f32[2,2,16,16], index: 11, kind: output, shape index: {1}]   ;;  %s2268_s12 = inlined_call_operand.hbm [shape: f32[2,2,16,16], index: 12, kind: output, shape index: {2}]  }
   0x1   :  { %2274 = sst [smem:[#allocation11_spill]] %s2257_s1  ;;  %s18_s23 = sshll.u32 %s2256_s0, 4  ;;  %s19_s23 = int_to_ptr.vmem [resolvable:$true] %s18_s23 }
   0x2   :  { %2275 = sst [smem:[#allocation12_spill]] %s2258_s2  ;;  %s1689_s24 = scalar_lea.vmem %s19_s23, 16 }
   0x3   :  { %2276 = sst [smem:[#allocation13_spill]] %s2260_s4  ;;  %p1690_p0 = scmp.ne.s32.totalorder %s19_s23, %s1689_s24 }
   0x4   :  { %2277 = sst [smem:[#allocation14_spill]] %s2261_s5  ;;  %p1694_p1 = scmp.lt.s32.totalorder %s19_s23, %s19_s23 }
   0x5   :  { %2278 = sst [smem:[#allocation15_spill]] %s2262_s6  ;;  %p1695_p2 = scmp.lt.s32.totalorder %s1689_s24, %s1689_s24 }
   0x6   :  { %2279 = sst [smem:[#allocation16_spill]] %s2264_s8 }
   0x7   :  { %p1696_p3 = por %p1695_p2, %p1694_p1 }
   0x9   :  { %p1697_p4 = pnand %p1696_p3, %p1690_p0 }
   0xb   :  { %1700 = shalt.err (!%p1697_p4)  }
   0xc   :  { %s1799_s25 = smov [#allocation3]  }
   0xd   :  { %21 = dma.vmem_to_smem %s19_s23, 16, %s1799_s25, [#allocation2] }
   0xe   :  { %1773 = dma.done.wait [#allocation2], 16 }
   0xf   :  { %1774 = vsyncadd [#allocation2], 4294967280 }
  0x10   :  { %23 = sfence }
  0x11   :  { %24 = vsyncpa [#allocation5], 0 }
  0x12   :  { %26 = vsyncpa [#allocation5 + $0x1], 0 }
  0x13   :  { %27 = vsyncpa [#allocation7], 0 }
  0x14   :  { %29 = vsyncpa [#allocation7 + $0x1], 0  ;;  %s1882_s26 = smov 0   ;;  %s1884_s0 = smov 0  }
  0x15   :  { %s1886_s27 = smov 0   ;;  %s1888_s28 = smov 0  }
  0x16 LB: > { %s1903_s29 = sadd.s32 4294967295, %s1797_s28   ;;  %s1442_s30 = sadd.s32 4294967294, %s1797_s28   ;;  %s1797_s28 = sphi %s1888_s28, %s2304_s28   ;;  %s1793_s27 = sphi %s1886_s27, %s2303_s27   ;;  %s1789_s0 = sphi %s1884_s0, %s2302_s0   ;;  %s1785_s26 = sphi %s1882_s26, %s2301_s26  }
  0x17   : > { %s1907_s13 = sadd.s32 1, %s1797_s28   ;;  %s282_s14 = sadd.s32 1, %s1793_s27 }
  0x18   : > { %s279_s15 = ssub.s32 %s1797_s28, %s1907_s13  ;;  %p292_p5 = scmp.ne.s32.totalorder %s1793_s27, %s1789_s0 }
  0x19   : > { %p280_p6 = scmp.eq.s32.totalorder %s279_s15, 0  ;;  %p293_p7 = scmp.eq.s32.totalorder %s1903_s29, 1 }
  0x1a   : > { %p298_p8 = scmp.ne.s32.totalorder %s1789_s0, %s1785_s26  ;;  %p299_p9 = scmp.eq.s32.totalorder %s1442_s30, 1 }
  0x1b   : > { %s1918_s16 = scalar_select %p280_p6, %s1793_s27, %s282_s14  }
  0x1c   : > { %p1920_p10 = por %p293_p7, %p292_p5  ;;  %p1924_p11 = por %p299_p9, %p298_p8 }
  0x1d   : > { %p1445_p12 = scmp.ge.s32.totalorder %s1797_s28, 1  ;;  %p393_p13 = scmp.lt.s32.totalorder %s1797_s28, 3 }
  0x1f   : > { %p394_p0 = pnand %p1445_p12, %p393_p13 }
  0x20   : > { %p461_p1 = scmp.lt.s32.totalorder (!%p394_p0), %s1903_s29, 1  ;;  %v1800_v0 = vmov (!%p394_p0), 0.0   ;;  %vm2271_vm0 = vmmov (!%p394_p0), 0   ;;  %v1802_v1 = vmov (!%p394_p0), 0   ;;  %s2282_s1 = sld [smem:[#allocation11_spill]] (!%p394_p0)  ;;  %vm1804_vm3 = vmmov (!%p394_p0), 1  }
  0x21   : > { %397 = sbr.rel (%p394_p0) target bundleno = 1818 (0x71a), region = 56  ;;  %1518 = vmatprep.subr.bf16.mxu0 (!%p394_p0), %v1800_v0  ;;  %1520 = vmatprep.mubr.msk.bf16.mxu0 (!%p394_p0), %vm2271_vm0, %v1800_v0  ;;  %s2283_s5 = sld [smem:[#allocation14_spill]] (!%p394_p0)  ;;  %vm560_vm6 = vcmask (!%p394_p0), 130048   ;;  %v504_v9 = vlaneseq (!%p394_p0) }
  0x22   : > { %1524 = vmatprep.subr.bf16.mxu1 (!%p394_p0), %v1800_v0  ;;  %1526 = vmatprep.mubr.msk.bf16.mxu1 (!%p394_p0), %vm2271_vm0, %v1800_v0  ;;  %s1803_s15 = smov (!%p394_p0), 96   ;;  %s1458_s22 = sld [smem:[#allocation3 + $0x1]] (!%p394_p0) }
  0x23   : > { %1639 = vset.pattern.permute.xlu0 (!%p394_p0), %v1802_v1  ;;  %1640 = vset.pattern.permute.xlu1 (!%p394_p0), %v1802_v1  ;;  %s2284_s4 = sld [smem:[#allocation13_spill]] (!%p394_p0)  ;;  %v505_v10 = vshrl.u32 (!%p394_p0), %v504_v9, 7  ;;  %v508_v17 = vand.u32 (!%p394_p0), 127, %v504_v9  ;;  %s502_s30 = sld [smem:[#allocation3]] (!%p394_p0) }
  0x24   : > { %s2293_s2 = sld [smem:[#allocation12_spill]] (!%p394_p0)  ;;  %s2295_s6 = sld [smem:[#allocation15_spill]] (!%p394_p0) }
  0x25   : > { %v523_v12 = vsub.s32 (!%p394_p0), 0, %v505_v10  ;;  %v506_v14 = vadd.s32 (!%p394_p0), 8, %v505_v10  ;;  %vm540_vm8 = vcmp.lt.s32.totalorder (!%p394_p0), %v508_v17, %v505_v10  ;;  %s2296_s8 = sld [smem:[#allocation16_spill]] (!%p394_p0) }
  0x27   : > { %vm541_vm12 = vcmp.lt.s32.totalorder (!%p394_p0), %v508_v17, %v506_v14 }
  0x28   : > { %s1935_s19 = scalar_select %p461_p1, %s1903_s29, 1  ;;  %v542_v16 = vstv %s1458_s22 }
  0x29   : > { %v543_v18 = vadd.s32 %v542_v16, %v505_v10  ;;  %v544_v19 = vadd.s32 %v542_v16, %v506_v14  ;;  %v513_v24 = vstv %s502_s30 }
  0x2a   : > { %s1489_s20 = sshll.u32 %s1935_s19, 3  ;;  %s1943_s21 = sshll.u32 %s1935_s19, 4  ;;  %v514_v25 = vsub.s32 %v505_v10, %v513_v24  ;;  %v515_v26 = vsub.s32 %v506_v14, %v513_v24 }
  0x2b   : > { %s465_s24 = scalar_lea.vmem %s2282_s1, %s1489_s20  ;;  %s483_s14 = scalar_lea.vmem %s2283_s5, %s1943_s21  ;;  %vm545_vm9 = vcmp.gt.s32.totalorder %v508_v17, %v543_v18  ;;  %vm546_vm13 = vcmp.gt.s32.totalorder %v508_v17, %v544_v19 }
  0x2c   : > { %v1955_v2 = vld [vmem:[%s465_s24] sm:$0xff]   ;;  %v1959_v4 = vld [vmem:[%s483_s14 + $0x8] sm:$0xff]  ;;  %s478_s25 = scalar_lea.vmem %s2284_s4, %s1935_s19  ;;  %vm547_vm11 = vmor %vm540_vm8, %vm545_vm9  ;;  %vm511_vm8 = vcmp.gt.s32.totalorder %v508_v17, %v505_v10  ;;  %vm516_vm9 = vcmp.lt.s32.totalorder %v508_v17, %v514_v25  ;;  %s470_s23 = scalar_lea.vmem %s2293_s2, %s1489_s20 }
  0x2d   : > { %v1957_v3 = vld [vmem:[%s483_s14] sm:$0xff]  ;;  %558 = vrot.lane.b32.xlu0 %v1955_v2, %s1803_s15  ;;  %vm2269_vm2 = vcmp.gt.f32.partialorder %v1959_v4, 0.5  ;;  %s1805_s19 = smov 64   ;;  %s1806_s20 = smov 112  }
  0x2e   : > { %vm2270_vm1 = vcmp.gt.f32.partialorder %v1957_v3, 0.5  ;;  %vm510_vm5 = vmxor %vm2269_vm2, %vm1804_vm3  ;;  %v496_v11 = vld [vmem:[%s478_s25] sm:$0x1]  ;;  %s1807_s24 = smov 80   ;;  %s2027_s25 = sand.u32 1, %s1789_s0  }
  0x2f   : > { %vm509_vm4 = vmxor %vm2270_vm1, %vm1804_vm3  ;;  %v529_v6 = vsel %vm510_vm5, 1, %v1802_v1  ;;  %vm497_vm7 = vcmp.gt.f32.partialorder %v496_v11, 0.5  ;;  %v2021_v49 = vld [vmem:[%s470_s23] sm:$0xff]   ;;  %s1446_s30 = sshll.u32 %s2027_s25, 5  ;;  %s1810_s2 = smov [#allocation4]  }
  0x30   : > { %v528_v5 = vsel %vm509_vm4, 1, %v1802_v1  ;;  %534 = vperm.xlu1 %1640, %v529_v6   ;;  %v520_v13 = vsel %vm497_vm7, 1, %v1802_v1  ;;  %vm548_vm4 = vmor %vm541_vm12, %vm546_vm13  ;;  %s2033_s14 = scalar_lea.vmem [#allocation4], %s1446_s30  ;;  %v688_v58 = vsel %vm560_vm6, %v2021_v49, 0  ;;  %s2095_s22 = scalar_lea.vmem [#allocation6], %s1446_s30 }
  0x31   : > { %531 = vperm.xlu0 %1639, %v528_v5   ;;  %v524_v15 = vrot.slane %v520_v13, %v523_v12  ;;  %vm518_vm1 = vmor %vm511_vm8, %vm516_vm9  ;;  %s1262_s30 = sshll.u32 %s2033_s14, 4  ;;  %s1705_s4 = sshll.u32 %s1810_s2, 4  ;;  %s2157_s30 = int_to_ptr.vmem [resolvable:$true] %s1262_s30  ;;  %s1706_s4 = int_to_ptr.vmem [resolvable:$false] %s1705_s4 }
  0x32   : > { %s1701_s1 = scalar_lea.vmem %s2157_s30, 512  ;;  %p1708_p5 = scmp.lt.s32.totalorder %s2157_s30, %s1706_s4 }
  0x33   : > { %vm525_vm10 = vcmp.eq.s32.totalorder %v524_v15, 1  ;;  %p1702_p2 = scmp.ne.s32.totalorder %s2157_s30, %s1701_s1 }
  0x34   : > { %vm549_vm14 = vmor %vm547_vm11, %vm525_vm10  ;;  %vm512_vm11 = vcmp.gt.s32.totalorder %v508_v17, %v506_v14 }
  0x35   : > { %vm550_vm7 = vmor %vm548_vm4, %vm525_vm10  ;;  %p1703_p3 = pnand %p1702_p2, %p1920_p10 }
  0x36   : > { %vm526_vm12 = vmor %vm518_vm1, %vm525_vm10  ;;  %vm2297_vm1 = vcmp.gt.f32.partialorder %v1957_v3, 0.5 }
  0x37   : > { %p1704_p4 = pneg %p1703_p3 }
  0x9f   : > { %v559_v7 = vpop.permute.xlu0 %558 }
  0xa0   : > { %v565_v8 = vsel %vm560_vm6, %v559_v7, 0 }
  0xa1   : > { %1519 = vmatpush3.bf16.xpose.msra.mxu0 %v565_v8 }
  0xa2   : > { %1536 = vmatprep.subr.bf16.mxu0 %v1800_v0 }
  0xa8   : > { %1521 = vmatmul.mubr.msk.bf16.vlgmr.msra.gmra.mrb[0].mxu0 %vm560_vm6, %v1955_v2 }
  0xa9   : > { %1538 = vmatprep.mubr.msk.bf16.mxu0 %vm2271_vm0, %v1800_v0 }
  0xaf   : > { %v535_v22 = vpop.permute.xlu1 %534 }
  0xb0   : > { %v532_v20 = vpop.permute.xlu0 %531  ;;  %vm537_vm5 = vcmp.eq.s32.totalorder %v535_v22, 1 }
  0xb1   : > { %vm536_vm15 = vcmp.eq.s32.totalorder %v532_v20, 1  ;;  %vm1990_vm2 = vmand %vm550_vm7, %vm537_vm5 }
  0xb2   : > { %vm1984_vm3 = vmand %vm549_vm14, %vm536_vm15  ;;  %vm517_vm14 = vcmp.lt.s32.totalorder %v508_v17, %v515_v26 }
  0xb3   : > { %vm519_vm0 = vmor %vm512_vm11, %vm517_vm14 }
  0xb4   : > { %vm527_vm13 = vmor %vm519_vm0, %vm525_vm10  ;;  %vm2294_vm0 = vmmov 0   ;;  %vm1104_vm10 = vcmask 261120  }
  0xb5   : > { %vm1997_vm4 = vmand %vm526_vm12, %vm536_vm15 }
  0xb6   : > { %vm2002_vm7 = vmand %vm527_vm13, %vm537_vm5 }
 0x17b   : > { %v601_v27 = vpop.f32.mrb[0].mxu0 }
 0x17c   : > { %v608_v29 = vmul.f32 0.25, %v601_v27  ;;  %v1522_v30 = vpop.f32.mrb[1].mxu0 }
 0x17d   : > { %v604_v32 = vpop.f32.mrb[2].mxu0 }
 0x17e   : > { %v609_v33 = vmul.f32 0.25, %v604_v32  ;;  %v1523_v34 = vpop.f32.mrb[3].mxu0  ;;  %v610_v35 = vsel %vm1997_vm4, -1e+30, %v608_v29 }
 0x17f   : > { %v612_v36 = vsel %vm560_vm6, %v610_v35, -inf }
 0x180   : > { %613 = vmax.xlane.f32.xlu1 %v612_v36  ;;  %v611_v37 = vsel %vm2002_vm7, -1e+30, %v609_v33 }
 0x181   : > { %v615_v38 = vsel %vm560_vm6, %v611_v37, -inf }
 0x182   : > { %616 = vmax.xlane.f32.xlu0 %v615_v38 }
 0x20d   : > { %v614_v39 = vpop.xlane.xlu1 %613 }
 0x20e   : > { %v618_v40 = vsub.f32 %v610_v35, %v614_v39 }
 0x20f   : > { %v617_v41 = vpop.xlane.xlu0 %616 }
 0x210   : > { %v620_v42 = vmul.f32 1.442695, %v618_v40  ;;  %v619_v43 = vsub.f32 %v611_v37, %v617_v41 }
 0x212   : > { %1657 = vpow2.f32 %v620_v42  ;;  %v622_v44 = vmul.f32 1.442695, %v619_v43 }
 0x214   : > { %1659 = vpow2.f32 %v622_v44 }
 0x21c   : > { %v1658_v45 = vpop.eup %1657 }
 0x21d   : > { %v624_v46 = vsel %vm560_vm6, %v1658_v45, 0.0 }
 0x21e   : > { %v1660_v47 = vpop.eup %1659  ;;  %625 = vadd.xlane.f32.xlu1 %v624_v46 }
 0x21f   : > { %v627_v48 = vsel %vm560_vm6, %v1660_v47, 0.0 }
 0x220   : > { %628 = vadd.xlane.f32.xlu0 %v627_v48 }
 0x22f   : > { %635 = vrot.lane.b32.xlu1 %v1955_v2, %s1805_s19 }
 0x233   : > { %809 = vrot.lane.b32.xlu1 %v1955_v2, %s1806_s20 }
 0x236   : > { %811 = vrot.lane.b32.xlu0 %v1955_v2, %s1807_s24 }
 0x237   : > { %934 = vrot.lane.b32.xlu1 %v2021_v49, %s1806_s20  ;;  %s1809_s20 = smov 16  }
 0x2ab   : > { %v626_v50 = vpop.xlane.xlu1 %625 }
 0x2ac   : > { %1661 = vrcp.f32 %v626_v50 }
 0x2ad   : > { %v629_v51 = vpop.xlane.xlu0 %628 }
 0x2ae   : > { %1663 = vrcp.f32 %v629_v51 }
 0x2af   : > { %v636_v52 = vpop.permute.xlu1 %635 }
 0x2b0   : > { %1525 = vmatpush3.bf16.msra.mxu1 %v636_v52 }
 0x2b1   : > { %1530 = vmatprep.subr.bf16.mxu1 %v1800_v0  ;;  %v812_v59 = vpop.permute.xlu0 %811 }
 0x2b2   : > { %v817_v61 = vsel %vm560_vm6, %v812_v59, 0 }
 0x2b3   : > { %v810_v60 = vpop.permute.xlu1 %809 }
 0x2b6   : > { %v1662_v53 = vpop.eup %1661 }
 0x2b7   : > { %v632_v54 = vmul.f32 %v1662_v53, %v1658_v45  ;;  %v935_v62 = vpop.permute.xlu1 %934 }
 0x2b8   : > { %v1664_v55 = vpop.eup %1663  ;;  %v937_v63 = vsel %vm560_vm6, %v935_v62, 0 }
 0x2b9   : > { %v633_v56 = vmul.f32 %v1664_v55, %v1660_v47  ;;  %805 = vst.msk [vmem:[%s2033_s14] sm:$0xff] %vm560_vm6, %v632_v54 }
 0x2bb   : > { %v634_v57 = vpack.c.bf16 %v633_v56, %v632_v54  ;;  %806 = vst.msk [vmem:[%s2033_s14 + $0x8] sm:$0xff] %vm560_vm6, %v633_v56 }
 0x2bd   : > { %1527 = vmatmul.mubr.msk.bf16.vlgmr.msra.gmra.mrb[0].mxu1 %vm560_vm6, %v634_v57 }
 0x2be   : > { %1531 = vmatpush3.bf16.xpose.msra.mxu1 %v688_v58  ;;  %1532 = vmatprep.mubr.msk.bf16.mxu1 %vm2294_vm0, %v1800_v0 }
 0x2bf   : > { %1542 = vmatprep.subr.bf16.mxu1 %v1800_v0 }
 0x2c5   : > { %1533 = vmatmul.mubr.msk.bf16.vlgmr.msra.gmra.mrb[4].mxu1 %vm560_vm6, %v1955_v2 }
 0x2c6   : > { %1543 = vmatpush3.bf16.xpose.msra.mxu1 %v817_v61  ;;  %1544 = vmatprep.mubr.msk.bf16.mxu1 %vm2294_vm0, %v1800_v0 }
 0x2c7   : > { %1554 = vmatprep.subr.bf16.mxu1 %v1800_v0 }
 0x2cd   : > { %1545 = vmatmul.mubr.msk.bf16.vlgmr.msra.gmra.mrb[8].mxu1 %vm560_vm6, %v810_v60 }
 0x2ce   : > { %1555 = vmatpush3.bf16.xpose.msra.mxu1 %v937_v63  ;;  %1556 = vmatprep.mubr.msk.bf16.mxu1 %vm2294_vm0, %v1800_v0 }
 0x2cf   : > { %1566 = vmatprep.subr.bf16.mxu1 %v1800_v0 }
 0x2d5   : > { %1557 = vmatmul.mubr.msk.bf16.vlgmr.msra.gmra.mrb[12].mxu1 %vm560_vm6, %v810_v60 }
 0x2d6   : > { %1570 = vmatprep.mubr.msk.bf16.mxu1 %vm2294_vm0, %v1800_v0 }
 0x390   : > { %v2059_v5 = vpop.f32.mrb[0].mxu1 }
 0x391   : > { %v1528_v6 = vpop.f32.mrb[1].mxu1 }
 0x392   : > { %v2061_v7 = vpop.f32.mrb[2].mxu1 }
 0x393   : > { %v1529_v8 = vpop.f32.mrb[3].mxu1 }
 0x398   : > { %v724_v9 = vpop.f32.mrb[4].mxu1 }
 0x399   : > { %v731_v10 = vmul.f32 0.25, %v724_v9  ;;  %v1534_v11 = vpop.f32.mrb[5].mxu1 }
 0x39a   : > { %v727_v12 = vpop.f32.mrb[6].mxu1 }
 0x39b   : > { %v732_v13 = vmul.f32 0.25, %v727_v12  ;;  %v1535_v14 = vpop.f32.mrb[7].mxu1  ;;  %v733_v15 = vsel %vm1984_vm3, -1e+30, %v731_v10 }
 0x39c   : > { %v735_v16 = vsel %vm560_vm6, %v733_v15, -inf }
 0x39d   : > { %736 = vmax.xlane.f32.xlu0 %v735_v16  ;;  %v734_v17 = vsel %vm1990_vm2, -1e+30, %v732_v13 }
 0x39e   : > { %v738_v18 = vsel %vm560_vm6, %v734_v17, -inf }
 0x39f   : > { %739 = vmax.xlane.f32.xlu1 %v738_v18 }
 0x3a0   : > { %v853_v19 = vpop.f32.mrb[8].mxu1 }
 0x3a1   : > { %v860_v20 = vmul.f32 0.25, %v853_v19  ;;  %v1546_v22 = vpop.f32.mrb[9].mxu1 }
 0x3a2   : > { %v856_v24 = vpop.f32.mrb[10].mxu1 }
 0x3a3   : > { %v861_v25 = vmul.f32 0.25, %v856_v24  ;;  %v1547_v26 = vpop.f32.mrb[11].mxu1  ;;  %v862_v27 = vsel %vm1997_vm4, -1e+30, %v860_v20 }
 0x3a4   : > { %v864_v29 = vsel %vm560_vm6, %v862_v27, -inf }
 0x3a5   : > { %865 = vmax.xlane.f32.xlu0 %v864_v29  ;;  %v863_v30 = vsel %vm2002_vm7, -1e+30, %v861_v25 }
 0x3a6   : > { %v867_v33 = vsel %vm560_vm6, %v863_v30, -inf }
 0x3a8   : > { %v973_v32 = vpop.f32.mrb[12].mxu1 }
 0x3a9   : > { %v980_v34 = vmul.f32 0.25, %v973_v32  ;;  %868 = vmax.xlane.f32.xlu0 %v867_v33  ;;  %v1558_v35 = vpop.f32.mrb[13].mxu1 }
 0x3aa   : > { %v976_v36 = vpop.f32.mrb[14].mxu1 }
 0x3ab   : > { %v981_v37 = vmul.f32 0.25, %v976_v36  ;;  %v1559_v38 = vpop.f32.mrb[15].mxu1  ;;  %v982_v39 = vsel %vm1984_vm3, -1e+30, %v980_v34 }
 0x3ac   : > { %v984_v28 = vsel %vm560_vm6, %v982_v39, -inf }
 0x3ad   : > { %985 = vmax.xlane.f32.xlu1 %v984_v28  ;;  %v983_v40 = vsel %vm1990_vm2, -1e+30, %v981_v37  ;;  %vm2298_vm2 = vcmp.gt.f32.partialorder %v1959_v4, 0.5 }
 0x3ae   : > { %v987_v31 = vsel %vm560_vm6, %v983_v40, -inf }
 0x3af   : > { %988 = vmax.xlane.f32.xlu0 %v987_v31 }
 0x3be   : > { %758 = vrot.lane.b32.xlu1 %v2021_v49, %s1803_s15  ;;  %s1808_s15 = smov 48  }
 0x42a   : > { %v737_v41 = vpop.xlane.xlu0 %736 }
 0x42b   : > { %v741_v42 = vsub.f32 %v733_v15, %v737_v41  ;;  %v1654_v41 = vld [vmem:[%s2295_s6 + $0x8] sm:$0xff]  }
 0x42c   : > { %v740_v43 = vpop.xlane.xlu1 %739 }
 0x42d   : > { %v743_v44 = vmul.f32 1.442695, %v741_v42  ;;  %v742_v45 = vsub.f32 %v734_v17, %v740_v43  ;;  %v1655_v43 = vld [vmem:[%s2296_s8] sm:$0xff]  }
 0x42f   : > { %1665 = vpow2.f32 %v743_v44  ;;  %v745_v21 = vmul.f32 1.442695, %v742_v45  ;;  %v1656_v45 = vld [vmem:[%s2296_s8 + $0x8] sm:$0xff]  }
 0x431   : > { %1667 = vpow2.f32 %v745_v21 }
 0x432   : > { %v866_v46 = vpop.xlane.xlu0 %865 }
 0x433   : > { %v870_v47 = vsub.f32 %v862_v27, %v866_v46 }
 0x435   : > { %v872_v48 = vmul.f32 1.442695, %v870_v47 }
 0x436   : > { %v869_v50 = vpop.xlane.xlu0 %868 }
 0x437   : > { %1669 = vpow2.f32 %v872_v48  ;;  %v871_v23 = vsub.f32 %v863_v30, %v869_v50  ;;  %v1221_v50 = vsel %vm2297_vm1, 1, %v1802_v1 }
 0x439   : > { %v1666_v51 = vpop.eup %1665  ;;  %v874_v52 = vmul.f32 1.442695, %v871_v23 }
 0x43a   : > { %v986_v53 = vpop.xlane.xlu1 %985  ;;  %v747_v54 = vsel %vm560_vm6, %v1666_v51, 0.0 }
 0x43b   : > { %v1668_v55 = vpop.eup %1667  ;;  %1671 = vpow2.f32 %v874_v52  ;;  %v990_v56 = vsub.f32 %v982_v39, %v986_v53  ;;  %748 = vadd.xlane.f32.xlu1 %v747_v54  ;;  %v1653_v39 = vld [vmem:[%s2295_s6] sm:$0xff]   ;;  %v1222_v54 = vsel %vm2298_vm2, 1, %v1802_v1 }
 0x43c   : > { %v989_v57 = vpop.xlane.xlu0 %988  ;;  %v750_v58 = vsel %vm560_vm6, %v1668_v55, 0.0  ;;  %1567 = vmatpush3.bf16.msra.mxu1 %v1653_v39 }
 0x43d   : > { %v992_v59 = vmul.f32 1.442695, %v990_v56  ;;  %v991_v60 = vsub.f32 %v983_v40, %v989_v57  ;;  %751 = vadd.xlane.f32.xlu0 %v750_v58  ;;  %1568 = vmatprep.subr.bf16.mxu1 %v1800_v0 }
 0x43e   : > { %v759_v61 = vpop.permute.xlu1 %758 }
 0x43f   : > { %1673 = vpow2.f32 %v992_v59  ;;  %v994_v62 = vmul.f32 1.442695, %v991_v60  ;;  %1537 = vmatpush3.bf16.msra.mxu0 %v759_v61 }
 0x440   : > { %1548 = vmatprep.subr.bf16.mxu0 %v1800_v0  ;;  %1569 = vmatpush3.bf16.msra.mxu1 %v1654_v41 }
 0x441   : > { %v1670_v63 = vpop.eup %1669  ;;  %1675 = vpow2.f32 %v994_v62 }
 0x442   : > { %v876_v6 = vsel %vm560_vm6, %v1670_v63, 0.0 }
 0x443   : > { %877 = vadd.xlane.f32.xlu1 %v876_v6 }
 0x445   : > { %v1672_v8 = vpop.eup %1671 }
 0x446   : > { %v879_v9 = vsel %vm560_vm6, %v1672_v8, 0.0 }
 0x447   : > { %880 = vadd.xlane.f32.xlu0 %v879_v9 }
 0x449   : > { %v1674_v10 = vpop.eup %1673 }
 0x44a   : > { %v996_v11 = vsel %vm560_vm6, %v1674_v10, 0.0 }
 0x44b   : > { %v1676_v12 = vpop.eup %1675  ;;  %997 = vadd.xlane.f32.xlu1 %v996_v11 }
 0x44c   : > { %v999_v13 = vsel %vm560_vm6, %v1676_v12, 0.0 }
 0x44d   : > { %1000 = vadd.xlane.f32.xlu0 %v999_v13 }
 0x45c   : > { %1007 = vrot.lane.b32.xlu1 %v2021_v49, %s1807_s24  ;;  %s2273_s24 = sshll.u32 %s1903_s29, 9 }
 0x45d   : > { %s2155_s19 = scalar_lea.hbm %s2267_s11, %s2273_s24 }
 0x463   : > { %887 = vrot.lane.b32.xlu0 %v1955_v2, %s1808_s15 }
 0x4c8   : > { %v749_v14 = vpop.xlane.xlu1 %748 }
 0x4c9   : > { %1677 = vrcp.f32 %v749_v14 }
 0x4ca   : > { %v752_v15 = vpop.xlane.xlu0 %751 }
 0x4cb   : > { %1679 = vrcp.f32 %v752_v15 }
 0x4d0   : > { %v878_v16 = vpop.xlane.xlu1 %877 }
 0x4d1   : > { %1681 = vrcp.f32 %v878_v16 }
 0x4d3   : > { %v1678_v17 = vpop.eup %1677 }
 0x4d4   : > { %v755_v18 = vmul.f32 %v1678_v17, %v1666_v51  ;;  %v881_v19 = vpop.xlane.xlu0 %880 }
 0x4d5   : > { %v1680_v20 = vpop.eup %1679  ;;  %1683 = vrcp.f32 %v881_v19 }
 0x4d6   : > { %807 = vst.msk [vmem:[%s2095_s22] sm:$0xff] %vm560_vm6, %v755_v18  ;;  %v756_v2 = vmul.f32 %v1680_v20, %v1668_v55 }
 0x4d8   : > { %808 = vst.msk [vmem:[%s2095_s22 + $0x8] sm:$0xff] %vm560_vm6, %v756_v2  ;;  %v998_v49 = vpop.xlane.xlu1 %997  ;;  %v757_v22 = vpack.c.bf16 %v756_v2, %v755_v18 }
 0x4d9   : > { %1685 = vrcp.f32 %v998_v49 }
 0x4da   : > { %1539 = vmatmul.mubr.msk.bf16.vlgmr.msra.gmra.mrb[4].mxu0 %vm560_vm6, %v757_v22  ;;  %v1001_v24 = vpop.xlane.xlu0 %1000 }
 0x4db   : > { %v1682_v25 = vpop.eup %1681  ;;  %1687 = vrcp.f32 %v1001_v24  ;;  %1550 = vmatprep.mubr.msk.bf16.mxu0 %vm2294_vm0, %v1800_v0 }
 0x4dc   : > { %v884_v26 = vmul.f32 %v1682_v25, %v1670_v63  ;;  %v1008_v33 = vpop.permute.xlu1 %1007 }
 0x4de   : > { %1469 = vst.msk [vmem:[%s2033_s14 + $0x10] sm:$0xff] %vm560_vm6, %v884_v26  ;;  %v888_v27 = vpop.permute.xlu0 %887 }
 0x4df   : > { %v1684_v29 = vpop.eup %1683  ;;  %1549 = vmatpush3.bf16.msra.mxu0 %v888_v27 }
 0x4e0   : > { %v885_v30 = vmul.f32 %v1684_v29, %v1672_v8  ;;  %1560 = vmatprep.subr.bf16.mxu0 %v1800_v0 }
 0x4e2   : > { %1470 = vst.msk [vmem:[%s2033_s14 + $0x18] sm:$0xff] %vm560_vm6, %v885_v30  ;;  %v886_v32 = vpack.c.bf16 %v885_v30, %v884_v26  ;;  %s1707_s14 = scalar_lea.vmem %s1706_s4, 1024 }
 0x4e3   : > { %v1686_v34 = vpop.eup %1685  ;;  %p1709_p6 = scmp.lt.s32.totalorder %s1707_s14, %s1701_s1 }
 0x4e4   : > { %v1004_v35 = vmul.f32 %v1686_v34, %v1674_v10  ;;  %1551 = vmatmul.mubr.msk.bf16.vlgmr.msra.gmra.mrb[8].mxu0 %vm560_vm6, %v886_v32 }
 0x4e5   : > { %v1688_v36 = vpop.eup %1687  ;;  %1561 = vmatpush3.bf16.msra.mxu0 %v1008_v33  ;;  %1562 = vmatprep.mubr.msk.bf16.mxu0 %vm2294_vm0, %v1800_v0  ;;  %p1710_p7 = por %p1709_p6, %p1708_p5 }
 0x4e6   : > { %1471 = vst.msk [vmem:[%s2095_s22 + $0x10] sm:$0xff] %vm560_vm6, %v1004_v35  ;;  %v1005_v37 = vmul.f32 %v1688_v36, %v1676_v12  ;;  %1574 = vmatprep.subr.bf16.mxu0 %v1800_v0 }
 0x4e7   : > { %p1711_p8 = pnand %p1710_p7, %p1704_p4 }
 0x4e8   : > { %1472 = vst.msk [vmem:[%s2095_s22 + $0x18] sm:$0xff] %vm560_vm6, %v1005_v37  ;;  %v1006_v38 = vpack.c.bf16 %v1005_v37, %v1004_v35 }
 0x4ec   : > { %1563 = vmatmul.mubr.msk.bf16.vlgmr.msra.gmra.mrb[12].mxu0 %vm560_vm6, %v1006_v38 }
 0x4ed   : > { %1578 = vmatprep.mubr.msk.bf16.mxu0 %vm2294_vm0, %v1800_v0  ;;  %1575 = vmatpush3.bf16.msra.mxu0 %v1655_v43 }
 0x4ee   : > { %1576 = vmatprep.subr.bf16.mxu0 %v1800_v0 }
 0x4f1   : > { %1577 = vmatpush3.bf16.msra.mxu0 %v1656_v45 }
 0x5ad   : > { %v798_v28 = vpop.f32.mrb[4].mxu0 }
 0x5ae   : > { %v1540_v40 = vpop.f32.mrb[5].mxu0 }
 0x5af   : > { %v801_v31 = vpop.f32.mrb[6].mxu0 }
 0x5b0   : > { %v1541_v42 = vpop.f32.mrb[7].mxu0 }
 0x5b7   : > { %v927_v44 = vpop.f32.mrb[8].mxu0 }
 0x5b8   : > { %v1552_v21 = vpop.f32.mrb[9].mxu0 }
 0x5b9   : > { %v930_v46 = vpop.f32.mrb[10].mxu0 }
 0x5ba   : > { %v1641_v47 = vpack.i.bf16 %v930_v46, %v927_v44  ;;  %v1553_v48 = vpop.f32.mrb[11].mxu0 }
 0x5bc   : > { %1642 = vrot.lane.b32.xlu1 %v1641_v47, %s1809_s20 }
 0x5bf   : > { %v1047_v23 = vpop.f32.mrb[12].mxu0 }
 0x5c0   : > { %1224 = vperm.xlu1 %1640, %v1221_v50   ;;  %v1564_v51 = vpop.f32.mrb[13].mxu0 }
 0x5c1   : > { %v1050_v0 = vpop.f32.mrb[14].mxu0 }
 0x5c2   : > { %v1646_v52 = vpack.i.bf16 %v1050_v0, %v1047_v23  ;;  %v1565_v53 = vpop.f32.mrb[15].mxu0 }
 0x5c4   : > { %1647 = vrot.lane.b32.xlu0 %v1646_v52, %s1809_s20 }
 0x5c8   : > { %1227 = vperm.xlu0 %1639, %v1222_v54  }
 0x62e   : > { %v1643_v55 = vpop.permute.xlu1 %1642 }
 0x62f   : > { %v1645_v56 = vunpack.i.h.bf16 %v1643_v55  ;;  %v1644_v57 = vunpack.i.l.bf16 %v1643_v55 }
 0x631   : > { %v1069_v3 = vsel %vm560_vm6, %v2061_v7, %v1645_v56  ;;  %v1068_v58 = vsel %vm560_vm6, %v2059_v5, %v1644_v57 }
 0x632   : > { %v1085_v59 = vpack.c.bf16 %v1069_v3, %v1068_v58 }
 0x634   : > { %1571 = vmatmul.mubr.msk.bf16.vlgmr.msra.gmra.mrb[16].mxu1 %vm1104_vm10, %v1085_v59 }
 0x636   : > { %v1648_v1 = vpop.permute.xlu0 %1647 }
 0x637   : > { %v1650_v4 = vunpack.i.h.bf16 %v1648_v1  ;;  %v1649_v60 = vunpack.i.l.bf16 %v1648_v1 }
 0x639   : > { %v1079_v61 = vsel %vm560_vm6, %v801_v31, %v1650_v4  ;;  %v1078_v62 = vsel %vm560_vm6, %v798_v28, %v1649_v60 }
 0x63a   : > { %v1154_v63 = vpack.c.bf16 %v1079_v61, %v1078_v62 }
 0x63c   : > { %1579 = vmatmul.mubr.msk.bf16.vlgmr.msra.gmra.mrb[16].mxu0 %vm1104_vm10, %v1154_v63 }
 0x63d   : > { %1714 = shalt.err (!%p1711_p8)
}
 0x63e   : > { %s1715_s15 = scalar_lea.hbm %s2155_s19, 512  ;;  %s1719_s2 = scalar_lea.hbm %s2267_s11, 1024 }
 0x63f   : > { %p1716_p9 = scmp.ne.s32.totalorder %s2155_s19, %s1715_s15  ;;  %p1720_p0 = scmp.lt.u32.totalorder %s2155_s19, %s2267_s11 }
 0x640   : > { %p1721_p1 = scmp.lt.u32.totalorder %s1719_s2, %s1715_s15  ;;  %p1723_p3 = scmp.lt.u32.totalorder %s1715_s15, %s2155_s19 }
 0x641   : > { %p1717_p12 = pnand %p1716_p9, %p1920_p10 }
 0x642   : > { %p1722_p2 = por %p1721_p1, %p1720_p0 }
 0x643   : > { %p1718_p13 = pneg %p1717_p12 }
 0x644   : > { %p1724_p4 = por %p1723_p3, %p1722_p2 }
 0x646   : > { %p1725_p5 = pnand %p1724_p4, %p1718_p13 }
 0x648   : > { %1728 = shalt.err (!%p1725_p5)
}
 0x649   : > { %s1811_s1 = smov 128   ;;  %s1812_s24 = smov 8  }
 0x64a   : > { %s2299_s20 = scalar_lea.sflag [#allocation5], %s2027_s25  ;;  %s2300_s14 = sshll.u32 %s1903_s29, 9 }
 0x64b   : > { %1582 = dma.vmem_to_hbm [thread:$0]  (%p1920_p10), %s2157_s30, 512, %s2155_s19, %s2299_s20, %s1811_s1, %s1811_s1, %s1812_s24  }
 0x64c   : > { %s2191_s2 = scalar_lea.hbm %s2268_s12, %s2300_s14  ;;  %s1278_s4 = sshll.u32 %s2095_s22, 4  ;;  %s2194_s4 = int_to_ptr.vmem [resolvable:$true] %s1278_s4 }
 0x64d   : > { %s1246_s5 = scalar_lea.sflag [#allocation7], %s2027_s25  ;;  %s1729_s6 = scalar_lea.vmem %s2194_s4, 512 }
 0x64e   : > { %p1730_p6 = scmp.ne.s32.totalorder %s2194_s4, %s1729_s6  ;;  %s1813_s8 = smov [#allocation6]  }
 0x64f   : > { %s1733_s30 = sshll.u32 %s1813_s8, 4  ;;  %s1734_s30 = int_to_ptr.vmem [resolvable:$false] %s1733_s30 }
 0x650   : > { %p1731_p7 = pnand %p1730_p6, %p1920_p10  ;;  %s1735_s29 = scalar_lea.vmem %s1734_s30, 1024 }
 0x651   : > { %p1736_p9 = scmp.lt.s32.totalorder %s2194_s4, %s1734_s30  ;;  %p1737_p12 = scmp.lt.s32.totalorder %s1735_s29, %s1729_s6 }
 0x652   : > { %p1732_p8 = pneg %p1731_p7 }
 0x653   : > { %p1738_p13 = por %p1737_p12, %p1736_p9 }
 0x655   : > { %p1739_p0 = pnand %p1738_p13, %p1732_p8 }
 0x657   : > { %1742 = shalt.err (!%p1739_p0)
}
 0x658   : > { %s1743_s22 = scalar_lea.hbm %s2191_s2, 512  ;;  %s1747_s8 = scalar_lea.hbm %s2268_s12, 1024 }
 0x659   : > { %p1744_p1 = scmp.ne.s32.totalorder %s2191_s2, %s1743_s22  ;;  %p1748_p4 = scmp.lt.u32.totalorder %s2191_s2, %s2268_s12 }
 0x65a   : > { %p1749_p5 = scmp.lt.u32.totalorder %s1747_s8, %s1743_s22  ;;  %p1751_p7 = scmp.lt.u32.totalorder %s1743_s22, %s2191_s2 }
 0x65b   : > { %p1745_p2 = pnand %p1744_p1, %p1920_p10 }
 0x65c   : > { %p1750_p6 = por %p1749_p5, %p1748_p4 }
 0x65d   : > { %p1746_p3 = pneg %p1745_p2 }
 0x65e   : > { %p1752_p8 = por %p1751_p7, %p1750_p6 }
 0x660   : > { %p1753_p9 = pnand %p1752_p8, %p1746_p3 }
 0x662   : > { %1756 = shalt.err (!%p1753_p9)
}
 0x663   : > { %1583 = dma.vmem_to_hbm [thread:$0]  (%p1920_p10), %s2194_s4, 512, %s2191_s2, %s1246_s5, %s1811_s1, %s1811_s1, %s1812_s24   ;;  %v1225_v17 = vpop.permute.xlu1 %1224  ;;  %v1228_v22 = vpop.permute.xlu0 %1227 }
 0x664   : > { %v1473_v9 = vld [vmem:[%s2263_s7] ss:$0 sm:$0xff]  ;;  %s475_s25 = scalar_lea.vmem %s2259_s3, %s1943_s21  ;;  %s488_s24 = scalar_lea.vmem %s2266_s10, %s1943_s21  ;;  %vm1229_vm6 = vcmp.eq.s32.totalorder %v1225_v17, 1  ;;  %vm1230_vm15 = vcmp.eq.s32.totalorder %v1228_v22, 1 }
 0x665   : > { %v1477_v10 = vld [vmem:[%s2265_s9] ss:$0 sm:$0xff]  ;;  %v495_v49 = vld [vmem:[%s475_s25 + $0x8] sm:$0xff] }
 0x666   : > { %v494_v15 = vld [vmem:[%s475_s25] sm:$0xff] }
 0x707   : > { %v1142_v5 = vpop.f32.mrb[16].mxu1 }
 0x708   : > { %v1572_v7 = vpop.f32.mrb[17].mxu1  ;;  %v1143_v12 = vadd.f32 %v1473_v9, %v1142_v5 }
 0x709   : > { %v1145_v6 = vpop.f32.mrb[18].mxu1 }
 0x70a   : > { %v1573_v8 = vpop.f32.mrb[19].mxu1  ;;  %v1146_v18 = vadd.f32 %v1473_v9, %v1145_v6 }
 0x70f   : > { %v1210_v11 = vpop.f32.mrb[16].mxu0 }
 0x710   : > { %v1211_v13 = vadd.f32 %v1477_v10, %v1210_v11  ;;  %v1580_v14 = vpop.f32.mrb[17].mxu0 }
 0x711   : > { %v1213_v16 = vpop.f32.mrb[18].mxu0 }
 0x712   : > { %v1217_v19 = vadd.f32 %v1211_v13, %v1143_v12  ;;  %v1214_v20 = vadd.f32 %v1477_v10, %v1213_v16  ;;  %v1581_v2 = vpop.f32.mrb[19].mxu0 }
 0x714   : > { %v1219_v24 = vadd.f32 %v1217_v19, %v494_v15  ;;  %v1218_v25 = vadd.f32 %v1214_v20, %v1146_v18 }
 0x716   : > { %v1231_v26 = vsel %vm1229_vm6, 0.0, %v1219_v24  ;;  %v1220_v27 = vadd.f32 %v1218_v25, %v495_v49 }
 0x717   : > { %1233 = vst.msk [vmem:[%s488_s24] sm:$0xff] %vm1104_vm10, %v1231_v26 }
 0x718   : > { %v1232_v29 = vsel %vm1230_vm15, 0.0, %v1220_v27 }
 0x719   : > { %1234 = vst.msk [vmem:[%s488_s24 + $0x8] sm:$0xff] %vm1104_vm10, %v1232_v29 }
 0x71a PF: > { %p1593_p10 = scmp.ge.s32.totalorder %s1797_s28, 2  ;;  %s1301_s2 = sand.u32 1, %s1785_s26  }
 0x71b   : > { %s1302_s21 = scalar_lea.sflag [#allocation5], %s1301_s2 }
 0x71c   : > { %p1587_p12 = pnand %p1593_p10, %p1924_p11 }
 0x71e   : > { %1776 = dma.done.wait (!%p1587_p12), %s1302_s21, 512  }
 0x71f   : > { %1778 = vsyncadd (!%p1587_p12), %s1302_s21, 4294966784  ;;  %s1311_s4 = scalar_lea.sflag [#allocation7], %s1301_s2 }
 0x720   : > { %1780 = dma.done.wait (!%p1587_p12), %s1311_s4, 512  }
 0x721   : > { %1782 = vsyncadd (!%p1587_p12), %s1311_s4, 4294966784  ;;  %p32_p13 = scmp.ge.s32.totalorder %s1907_s13, 4   ;;  %s2301_s26 = smov %s1789_s0 }
 0x722   : > { %s2302_s0 = smov %s1793_s27  ;;  %s2303_s27 = smov %s1918_s16 }
 0x723   : > { %s2304_s28 = smov %s1907_s13  ;;  %34 = sbr.rel (!%p32_p13) target bundleno = 22 (0x16), region = 134 }
 0x72a   :  { %1316 = vsyncpa [#allocation5], 1 }
 0x72b   :  { %1318 = vsyncpa [#allocation5 + $0x1], 1 }
 0x72c   :  { %1319 = vsyncpa [#allocation7], 1 }
 0x72d   :  { %1321 = vsyncpa [#allocation7 + $0x1], 1 }

// kernel: hybrid_attention_decoder_forward.15
= control target key start
LH: loop header
LB: loop body
LE: loop exit
PB: predicated region body
PF: predicated region fallthrough
CT: control target
= control target key end

     0   :  { %vm27_vm0 = vcmask 261120   ;;  %vm181_vm1 = vcmask 64512   ;;  %s298_s0 = inlined_call_operand.vmem [shape: f32[32,32], index: 0, kind: input, shape index: {}]   ;;  %s299_s3 = inlined_call_operand.vmem [shape: bf16[32,8], index: 3, kind: input, shape index: {}]   ;;  %s300_s1 = inlined_call_operand.vmem [shape: f32[1,32], index: 1, kind: input, shape index: {}]   ;;  %s301_s2 = inlined_call_operand.vmem [shape: f32[1,32], index: 2, kind: input, shape index: {}]   ;;  %s302_s4 = inlined_call_operand.vmem [shape: f32[1,8], index: 4, kind: input, shape index: {}]   ;;  %s303_s5 = inlined_call_operand.vmem [shape: f32[32,8], index: 5, kind: output, shape index: {}]  }
   0x1   :  { %v21_v0 = vld [vmem:[%s298_s0] sm:$0xff]  ;;  %v23_v1 = vld [vmem:[%s298_s0 + $0x10] sm:$0xff]  ;;  %v22_v2 = vld [vmem:[%s298_s0 + $0x8] sm:$0xff] }
   0x2   :  { %v28_v3 = vsel %vm27_vm0, %v21_v0, 0.0  ;;  %v34_v4 = vsel %vm27_vm0, %v23_v1, 0.0  ;;  %v24_v5 = vld [vmem:[%s298_s0 + $0x18] sm:$0xff]  ;;  %v31_v6 = vsel %vm27_vm0, %v22_v2, 0.0  ;;  %v209_v28 = vld [vmem:[%s299_s3] sm:$0xff]   ;;  %v210_v29 = vld [vmem:[%s299_s3 + $0x8] sm:$0xff]  }
   0x3   :  { %29 = vadd.xlane.f32.xlu0 %v28_v3  ;;  %35 = vadd.xlane.f32.xlu1 %v34_v4  ;;  %v37_v7 = vsel %vm27_vm0, %v24_v5, 0.0  ;;  %v190_v44 = vld [vmem:[%s300_s1] ss:$0 sm:$0xff] }
   0x4   :  { %201 = vmatprep.subr.bf16.mxu0 %v209_v28  ;;  %v191_v50 = vld [vmem:[%s301_s2] ss:$0 sm:$0xff] }
   0x5   :  { %202 = vmatpush3.bf16.msra.mxu0 %v209_v28  ;;  %v192_v62 = vld [vmem:[%s302_s4] ss:$0 sm:$0xff] }
   0x6   :  { %203 = vmatprep.subr.bf16.mxu0 %v210_v29 }
   0x7   :  { %32 = vadd.xlane.f32.xlu0 %v31_v6  ;;  %38 = vadd.xlane.f32.xlu1 %v37_v7 }
   0x9   :  { %204 = vmatpush3.bf16.msra.mxu0 %v210_v29 }
  0x90   :  { %v30_v8 = vpop.xlane.xlu0 %29  ;;  %v36_v9 = vpop.xlane.xlu1 %35 }
  0x91   :  { %v41_v10 = vmul.f32 0.03125, %v30_v8  ;;  %v43_v11 = vmul.f32 0.03125, %v36_v9 }
  0x93   :  { %v45_v12 = vsub.f32 %v21_v0, %v41_v10  ;;  %v47_v13 = vsub.f32 %v23_v1, %v43_v11 }
  0x94   :  { %v33_v14 = vpop.xlane.xlu0 %32  ;;  %v39_v15 = vpop.xlane.xlu1 %38 }
  0x95   :  { %v42_v16 = vmul.f32 0.03125, %v33_v14  ;;  %v44_v17 = vmul.f32 0.03125, %v39_v15  ;;  %v49_v18 = vmul.f32 %v45_v12, %v45_v12  ;;  %v51_v19 = vmul.f32 %v47_v13, %v47_v13 }
  0x97   :  { %v46_v20 = vsub.f32 %v22_v2, %v42_v16  ;;  %v48_v21 = vsub.f32 %v24_v5, %v44_v17  ;;  %v53_v22 = vsel %vm27_vm0, %v49_v18, 0.0  ;;  %v59_v23 = vsel %vm27_vm0, %v51_v19, 0.0 }
  0x98   :  { %54 = vadd.xlane.f32.xlu0 %v53_v22 }
  0x99   :  { %v50_v24 = vmul.f32 %v46_v20, %v46_v20  ;;  %v52_v25 = vmul.f32 %v48_v21, %v48_v21 }
  0x9b   :  { %v56_v26 = vsel %vm27_vm0, %v50_v24, 0.0  ;;  %v62_v27 = vsel %vm27_vm0, %v52_v25, 0.0 }
  0x9c   :  { %60 = vadd.xlane.f32.xlu0 %v59_v23  ;;  %57 = vadd.xlane.f32.xlu1 %v56_v26 }
  0xa0   :  { %63 = vadd.xlane.f32.xlu1 %v62_v27 }
 0x125   :  { %v55_v30 = vpop.xlane.xlu0 %54 }
 0x126   :  { %v65_v31 = vmul.f32 0.03125, %v55_v30 }
 0x128   :  { %v69_v32 = vadd.f32 1e-06, %v65_v31 }
 0x129   :  { %v58_v33 = vpop.xlane.xlu1 %57  ;;  %v61_v34 = vpop.xlane.xlu0 %60 }
 0x12a   :  { %211 = vrsqrt.f32 %v69_v32  ;;  %v66_v35 = vmul.f32 0.03125, %v58_v33  ;;  %v67_v36 = vmul.f32 0.03125, %v61_v34 }
 0x12c   :  { %v70_v37 = vadd.f32 1e-06, %v66_v35  ;;  %v71_v38 = vadd.f32 1e-06, %v67_v36 }
 0x12d   :  { %v64_v39 = vpop.xlane.xlu1 %63 }
 0x12e   :  { %213 = vrsqrt.f32 %v70_v37  ;;  %v68_v40 = vmul.f32 0.03125, %v64_v39 }
 0x12f   :  { %215 = vrsqrt.f32 %v71_v38 }
 0x130   :  { %v72_v41 = vadd.f32 1e-06, %v68_v40 }
 0x132   :  { %217 = vrsqrt.f32 %v72_v41 }
 0x134   :  { %v212_v42 = vpop.eup %211 }
 0x135   :  { %v77_v43 = vmul.f32 %v212_v42, %v45_v12 }
 0x137   :  { %v87_v48 = vmul.f32 %v190_v44, %v77_v43 }
 0x138   :  { %v214_v45 = vpop.eup %213 }
 0x139   :  { %v216_v46 = vpop.eup %215  ;;  %v78_v47 = vmul.f32 %v214_v45, %v46_v20  ;;  %v97_v54 = vadd.f32 %v191_v50, %v87_v48 }
 0x13a   :  { %v79_v49 = vmul.f32 %v216_v46, %v47_v13 }
 0x13b   :  { %v88_v51 = vmul.f32 %v190_v44, %v78_v47 }
 0x13c   :  { %v218_v52 = vpop.eup %217  ;;  %v89_v56 = vmul.f32 %v190_v44, %v79_v49 }
 0x13d   :  { %v80_v53 = vmul.f32 %v218_v52, %v48_v21  ;;  %v98_v55 = vadd.f32 %v191_v50, %v88_v51 }
 0x13e   :  { %v99_v59 = vadd.f32 %v191_v50, %v89_v56 }
 0x13f   :  { %v106_v57 = vpack.c.bf16 %v98_v55, %v97_v54  ;;  %v90_v58 = vmul.f32 %v190_v44, %v80_v53 }
 0x141   :  { %205 = vmatprep.mubr.msk.bf16.mxu0 %vm27_vm0, %v106_v57  ;;  %v100_v60 = vadd.f32 %v191_v50, %v90_v58 }
 0x143   :  { %v107_v61 = vpack.c.bf16 %v100_v60, %v99_v59 }
 0x145   :  { %206 = vmatmul.mubr.msk.bf16.vlgmr.msra.gmra.mrb[0].mxu0 %vm27_vm0, %v107_v61 }
 0x218   :  { %v207_v63 = vpop.f32.mrb[0].mxu0 }
 0x219   :  { %v175_v0 = vadd.f32 %v207_v63, %v192_v62  ;;  %v166_v1 = vpop.f32.mrb[1].mxu0 }
 0x21a   :  { %v167_v2 = vadd.f32 %v192_v62, %v166_v1  ;;  %v208_v3 = vpop.f32.mrb[2].mxu0 }
 0x21b   :  { %184 = vst.msk [vmem:[%s303_s5 + $0x10] sm:$0xff] %vm181_vm1, %v175_v0  ;;  %v178_v4 = vadd.f32 %v208_v3, %v192_v62  ;;  %v169_v5 = vpop.f32.mrb[3].mxu0 }
 0x21c   :  { %182 = vst.msk [vmem:[%s303_s5] sm:$0xff] %vm181_vm1, %v167_v2  ;;  %v170_v6 = vadd.f32 %v192_v62, %v169_v5 }
 0x21d   :  { %185 = vst.msk [vmem:[%s303_s5 + $0x18] sm:$0xff] %vm181_vm1, %v178_v4 }
 0x21e   :  { %183 = vst.msk [vmem:[%s303_s5 + $0x8] sm:$0xff] %vm181_vm1, %v170_v6 }

</bundles_post_ra>
